<compile_context>
chip_gen: v7x
topology: tpu7x:2x2x1
jax: 0.10.0
libtpu: 0.0.40
codegen_flags: <defaults>
</compile_context>

<pallas_src>
import jax
import jax.numpy as jnp
import numpy as np
from jax import lax
from jax.experimental import pallas as pl
from jax.experimental.pallas import tpu as pltpu


# ----------------------------- fused Pallas kernel ---------------------------

def fused_nnet_kernel(x_ref, feat_ref,
                      w1_ref, b1_ref,
                      w2_ref, b2_ref,
                      w1a_ref, w1b_ref, b1f_ref,
                      w2f_ref, b2f_ref,
                      w3_ref, b3_ref,
                      o_ref):
    f32 = jnp.float32
    bf16 = jnp.bfloat16
    tb = x_ref.shape[0]

    # ---- conv1 + bias + ReLU: one dense spatial matmul -----------------------
    # y1 lane index = q1*512 + p1*32 + c  (q1 = 2x2 pool quarter, p1 = 4x4 pos)
    y1 = jnp.dot(x_ref[...], w1_ref[...], preferred_element_type=f32)   # (tb, 2048)
    y1 = jnp.maximum(y1 + b1_ref[...], 0.0)

    # ---- pool1: max over the 4 pool quarters (128-lane-aligned slices) -------
    h1 = jnp.maximum(jnp.maximum(y1[:, 0:512], y1[:, 512:1024]),
                     jnp.maximum(y1[:, 1024:1536], y1[:, 1536:2048]))   # (tb, 512)

    # ---- conv2 + bias + ReLU: one dense matmul -------------------------------
    # y2 lane index = q2*256 + P2*64 + c_out  (q2 = pool quarter, P2 = 2x2 pos)
    y2 = jnp.dot(h1.astype(bf16), w2_ref[...], preferred_element_type=f32)  # (tb, 1024)
    y2 = jnp.maximum(y2 + b2_ref[...], 0.0)

    # ---- pool2 ---------------------------------------------------------------
    h2 = jnp.maximum(jnp.maximum(y2[:, 0:256], y2[:, 256:512]),
                     jnp.maximum(y2[:, 512:768], y2[:, 768:1024]))      # (tb, 256)

    # ---- fc1 (+ features) + ReLU: single K=256 matmul + tiny K=5 matmul ------
    a1 = (jnp.dot(h2.astype(bf16), w1a_ref[...], preferred_element_type=f32)
          + jnp.dot(feat_ref[...], w1b_ref[...], preferred_element_type=f32)
          + b1f_ref[...])
    a1 = jnp.maximum(a1, 0.0)                                           # (tb, 128)
    # TODO(synk): nn.Dropout(p=0.5) is identity in eval mode; training-mode RNG mask not implemented.

    # ---- fc2 + ReLU -----------------------------------------------------------
    a2 = jnp.dot(a1.astype(bf16), w2f_ref[...], preferred_element_type=f32)
    a2 = jnp.maximum(a2 + b2f_ref[...], 0.0)                            # (tb, 64)

    # ---- fc3 (N=1), produced lane-dense ---------------------------------------
    # Contract a2's channel dim against w3's channel dim ("NT" dims) so the
    # result comes out with batch in lanes; w3 is padded to 8 sublanes
    # (rows 1..7 zero) so the MXU M dim is clean.
    res = lax.dot_general(w3_ref[...], a2.astype(bf16),
                          (((1,), (1,)), ((), ())),
                          preferred_element_type=f32)                   # (8, tb)
    o_ref[0] = (res[0:1, :] + b3_ref[...]).astype(o_ref.dtype)          # (1, tb)


# ----------------------------- one-time weight repack -------------------------

def prepare_kernel_params(params):
    """Repack PyTorch-layout weights into kernel layout (call ONCE, not per step).

    conv1 / conv2 are unrolled into dense (spatial_in, spatial_out*channels)
    matrices whose column order groups the 2x2 max-pool quarters first, so the
    in-kernel pools are aligned lane-slice maxima, and pool2 + NCHW flatten
    feed fc1 through a single K=256 matmul.
    """
    f32, bf16 = np.float32, jnp.bfloat16

    c1w = np.asarray(params["conv1_w"], f32)      # (32, 1, 3, 3)
    c1b = np.asarray(params["conv1_b"], f32)      # (32,)
    c2w = np.asarray(params["conv2_w"], f32)      # (64, 32, 3, 3)
    c2b = np.asarray(params["conv2_b"], f32)      # (64,)
    fc1w = np.asarray(params["fc1_w"], f32)       # (128, 261)
    fc1b = np.asarray(params["fc1_b"], f32)
    fc2w = np.asarray(params["fc2_w"], f32)       # (64, 128)
    fc2b = np.asarray(params["fc2_b"], f32)
    fc3w = np.asarray(params["fc3_w"], f32)       # (1, 64)
    fc3b = np.asarray(params["fc3_b"], f32)       # (1,)

    # conv1 -> (64, 2048): row = input position hi*8+wi,
    # col = q1*512 + p1*32 + c  with q1=(ho%2)*2+(wo%2), p1=(ho//2)*4+(wo//2).
    W1 = np.zeros((64, 4, 16, 32), f32)
    for ho in range(8):
        for wo in range(8):
            q1 = (ho % 2) * 2 + (wo % 2)
            p1 = (ho // 2) * 4 + (wo // 2)
            for kh in range(3):
                for kw in range(3):
                    hi, wi = ho + kh - 1, wo + kw - 1
                    if 0 <= hi < 8 and 0 <= wi < 8:
                        W1[hi * 8 + wi, q1, p1, :] = c1w[:, 0, kh, kw]
    W1 = W1.reshape(64, 2048)
    B1 = np.tile(c1b, 64).reshape(1, 2048)

    # conv2 -> (512, 1024): row = p1_in*32 + c_in (h1 lane order),
    # col = q2*256 + P2*64 + c_out with q2=(io%2)*2+(jo%2), P2=(io//2)*2+(jo//2).
    W2 = np.zeros((16, 32, 4, 4, 64), f32)
    for io in range(4):
        for jo in range(4):
            q2 = (io % 2) * 2 + (jo % 2)
            P2 = (io // 2) * 2 + (jo // 2)
            for kh in range(3):
                for kw in range(3):
                    ii, jj = io + kh - 1, jo + kw - 1
                    if 0 <= ii < 4 and 0 <= jj < 4:
                        W2[ii * 4 + jj, :, q2, P2, :] = c2w[:, :, kh, kw].T
    W2 = W2.reshape(512, 1024)
    B2 = np.tile(c2b, 16).reshape(1, 1024)

    # fc1: torch flatten index of the conv part is c*4 + P2; our h2 lane order
    # is P2*64 + c -> permute the first 256 fc1 columns accordingly.
    W1a = fc1w[:, :256].reshape(128, 64, 4).transpose(2, 1, 0).reshape(256, 128)
    W1b = fc1w[:, 256:].T                          # (5, 128)

    # fc3 weight padded to 8 sublanes (row 0 real, rows 1..7 zero).
    W3 = np.zeros((8, 64), f32)
    W3[0, :] = fc3w[0, :]

    return (jnp.asarray(W1, bf16), jnp.asarray(B1, jnp.float32),
            jnp.asarray(W2, bf16), jnp.asarray(B2, jnp.float32),
            jnp.asarray(W1a, bf16), jnp.asarray(W1b, bf16),
            jnp.asarray(fc1b.reshape(1, 128), jnp.float32),
            jnp.asarray(fc2w.T, bf16),
            jnp.asarray(fc2b.reshape(1, 64), jnp.float32),
            jnp.asarray(W3, bf16),
            jnp.asarray(fc3b.reshape(1, 1), jnp.float32))


# ----------------------------- wrapper ----------------------------------------

def _tiling(batch):
    """Return (padded batch, rows per grid step).

    Big tiles amortize the ~0.35 us/step overhead and fill the MXU M dim;
    once the batch exceeds one tile we keep >=2 grid steps (capped at 256
    rows/step) so dimension_semantics=("parallel",) can use both v7x TCs.
    """
    bp = max(8, ((batch + 7) // 8) * 8)
    if bp <= 128:
        tb = bp
    else:
        tb = min(256, ((bp // 2 + 7) // 8) * 8)
    bp = ((bp + tb - 1) // tb) * tb
    return bp, tb


@jax.jit
def nnet_forward(kparams, x_spatial, x_features):
    (w1, b1, w2, b2, w1a, w1b, b1f, w2f, b2f, w3, b3) = kparams
    B = x_spatial.shape[0]
    Bp, tb = _tiling(B)
    G = Bp // tb

    x = x_spatial.reshape(B, 64).astype(jnp.bfloat16)      # raw 8x8 input, flattened
    feat = x_features.astype(jnp.bfloat16)
    if Bp != B:
        x = jnp.pad(x, ((0, Bp - B), (0, 0)))
        feat = jnp.pad(feat, ((0, Bp - B), (0, 0)))

    def _full(shape):
        nd = len(shape)
        return pl.BlockSpec(shape, lambda i, _n=nd: (0,) * _n)

    out = pl.pallas_call(
        fused_nnet_kernel,
        out_shape=jax.ShapeDtypeStruct((G, 1, tb), jnp.float32),
        grid=(G,),
        in_specs=[
            pl.BlockSpec((tb, 64), lambda i: (i, 0)),   # raw spatial input
            pl.BlockSpec((tb, 5), lambda i: (i, 0)),    # hand-crafted features
            _full((64, 2048)), _full((1, 2048)),        # conv1 (dense spatial) w, b
            _full((512, 1024)), _full((1, 1024)),       # conv2 (dense spatial) w, b
            _full((256, 128)), _full((5, 128)), _full((1, 128)),  # fc1 w (conv/feat), b
            _full((128, 64)), _full((1, 64)),           # fc2 w, b
            _full((8, 64)), _full((1, 1)),              # fc3 w (padded to 8 rows), b
        ],
        out_specs=pl.BlockSpec((1, 1, tb), lambda i: (i, 0, 0)),   # lane-dense output
        compiler_params=pltpu.CompilerParams(
            dimension_semantics=("parallel",)),
    )(x, feat, w1, b1, w2, b2, w1a, w1b, b1f, w2f, b2f, w3, b3)
    return out.reshape(Bp, 1)[:B]


# ----------------------------- pure-JAX reference ------------------------------

def reference_forward(params, x_spatial, x_features):
    def conv2d(x, w, b):
        y = lax.conv_general_dilated(x, w, (1, 1), "SAME",
                                     dimension_numbers=("NCHW", "OIHW", "NCHW"))
        return y + b[None, :, None, None]

    def maxpool2(x):
        return lax.reduce_window(x, -jnp.inf, lax.max, (1, 1, 2, 2), (1, 1, 2, 2), "VALID")

    B = x_spatial.shape[0]
    y = maxpool2(jax.nn.relu(conv2d(x_spatial, params["conv1_w"], params["conv1_b"])))
    y = maxpool2(jax.nn.relu(conv2d(y, params["conv2_w"], params["conv2_b"])))
    x = jnp.concatenate([y.reshape(B, -1), x_features], axis=1)
    h = jax.nn.relu(x @ params["fc1_w"].T + params["fc1_b"])
    h = jax.nn.relu(h @ params["fc2_w"].T + params["fc2_b"])
    return h @ params["fc3_w"].T + params["fc3_b"]


# ----------------------------- params -------------------------------------------

def init_params(key):
    ks = jax.random.split(key, 10)

    def w(k, shape, scale=0.05):
        return (scale * jax.random.normal(k, shape)).astype(jnp.float32)

    return {
        "conv1_w": w(ks[0], (32, 1, 3, 3)),
        "conv1_b": w(ks[1], (32,)),
        "conv2_w": w(ks[2], (64, 32, 3, 3)),
        "conv2_b": w(ks[3], (64,)),
        "fc1_w": w(ks[4], (128, 64 * 2 * 2 + 5)),
        "fc1_b": w(ks[5], (128,)),
        "fc2_w": w(ks[6], (64, 128)),
        "fc2_b": w(ks[7], (64,)),
        "fc3_w": w(ks[8], (1, 64)),
        "fc3_b": w(ks[9], (1,)),
    }


if __name__ == "__main__":
    key = jax.random.PRNGKey(0)
    kp, kx, kf = jax.random.split(key, 3)
    params = init_params(kp)
    kparams = prepare_kernel_params(params)   # one-time weight repack (hoisted out of the call path)

    # 8x8 spatial input => two 2x2 pools => 2x2, matching fc1 (64*2*2 + 5).
    B = 16
    x_spatial = jax.random.normal(kx, (B, 1, 8, 8), dtype=jnp.float32)   # NCHW
    x_features = jax.random.normal(kf, (B, 5), dtype=jnp.float32)

    out = jax.block_until_ready(nnet_forward(kparams, x_spatial, x_features))
    assert out.shape == (B, 1), out.shape

    ref = jax.block_until_ready(reference_forward(params, x_spatial, x_features))
    assert jnp.allclose(out, ref, atol=2e-2, rtol=2e-2), (out, ref)

    print("KERNEL_OK")
</pallas_src>

<mosaic_0001>
module attributes {stable_mosaic.version = 11 : i64} {
  func.func @fused_nnet_kernel(%arg0: i32, %arg1: memref<16x64xbf16, #tpu.memory_space<vmem>>, %arg2: memref<16x5xbf16, #tpu.memory_space<vmem>>, %arg3: memref<64x2048xbf16, #tpu.memory_space<vmem>>, %arg4: memref<1x2048xf32, #tpu.memory_space<vmem>>, %arg5: memref<512x1024xbf16, #tpu.memory_space<vmem>>, %arg6: memref<1x1024xf32, #tpu.memory_space<vmem>>, %arg7: memref<256x128xbf16, #tpu.memory_space<vmem>>, %arg8: memref<5x128xbf16, #tpu.memory_space<vmem>>, %arg9: memref<1x128xf32, #tpu.memory_space<vmem>>, %arg10: memref<128x64xbf16, #tpu.memory_space<vmem>>, %arg11: memref<1x64xf32, #tpu.memory_space<vmem>>, %arg12: memref<8x64xbf16, #tpu.memory_space<vmem>>, %arg13: memref<1x1xf32, #tpu.memory_space<vmem>>, %arg14: memref<1x1x16xf32, #tpu.memory_space<vmem>>) attributes {dimension_semantics = [#tpu.dimension_semantics<parallel>], iteration_bounds = array<i64: 1>, scalar_prefetch = 0 : i64, scratch_operands = 0 : i64, tpu.core_type = #tpu.core_type<tc>, window_params = [{transform_indices = @transform_0, window_bounds = array<i64: 16, 64>}, {transform_indices = @transform_1, window_bounds = array<i64: 16, 5>}, {pipeline_mode = #tpu.pipeline_mode<synchronous>, transform_indices = @transform_2, window_bounds = array<i64: 64, 2048>}, {pipeline_mode = #tpu.pipeline_mode<synchronous>, transform_indices = @transform_3, window_bounds = array<i64: 1, 2048>}, {pipeline_mode = #tpu.pipeline_mode<synchronous>, transform_indices = @transform_4, window_bounds = array<i64: 512, 1024>}, {pipeline_mode = #tpu.pipeline_mode<synchronous>, transform_indices = @transform_5, window_bounds = array<i64: 1, 1024>}, {pipeline_mode = #tpu.pipeline_mode<synchronous>, transform_indices = @transform_6, window_bounds = array<i64: 256, 128>}, {pipeline_mode = #tpu.pipeline_mode<synchronous>, transform_indices = @transform_7, window_bounds = array<i64: 5, 128>}, {pipeline_mode = #tpu.pipeline_mode<synchronous>, transform_indices = @transform_8, window_bounds = array<i64: 1, 128>}, {pipeline_mode = #tpu.pipeline_mode<synchronous>, transform_indices = @transform_9, window_bounds = array<i64: 128, 64>}, {pipeline_mode = #tpu.pipeline_mode<synchronous>, transform_indices = @transform_10, window_bounds = array<i64: 1, 64>}, {pipeline_mode = #tpu.pipeline_mode<synchronous>, transform_indices = @transform_11, window_bounds = array<i64: 8, 64>}, {pipeline_mode = #tpu.pipeline_mode<synchronous>, transform_indices = @transform_12, window_bounds = array<i64: 1, 1>}, {transform_indices = @transform_13, window_bounds = array<i64: 1, 1, 16>}]} {
    %c0 = arith.constant 0 : index
    %c0_0 = arith.constant 0 : index
    %0 = vector.load %arg1[%c0, %c0_0] : memref<16x64xbf16, #tpu.memory_space<vmem>>, vector<16x64xbf16>
    %c0_1 = arith.constant 0 : index
    %c0_2 = arith.constant 0 : index
    %1 = vector.load %arg3[%c0_1, %c0_2] : memref<64x2048xbf16, #tpu.memory_space<vmem>>, vector<64x2048xbf16>
    %cst = arith.constant dense<0.000000e+00> : vector<16x2048xf32>
    %2 = tpu.matmul %0, %1, %cst {dimension_numbers = #tpu.dot_dimension_numbers<[1], [0], [0], [1], [0, 0, 1, 1], [], []>} : vector<16x64xbf16>, vector<64x2048xbf16>, vector<16x2048xf32> -> vector<16x2048xf32>
    %c0_3 = arith.constant 0 : index
    %c0_4 = arith.constant 0 : index
    %3 = vector.load %arg4[%c0_3, %c0_4] : memref<1x2048xf32, #tpu.memory_space<vmem>>, vector<1x2048xf32>
    %4 = vector.broadcast %3 : vector<1x2048xf32> to vector<16x2048xf32>
    %5 = arith.addf %2, %4 : vector<16x2048xf32>
    %cst_5 = arith.constant 0.000000e+00 : f32
    %6 = vector.broadcast %cst_5 : f32 to vector<16x2048xf32>
    %7 = arith.maximumf %5, %6 : vector<16x2048xf32>
    %8 = vector.extract_strided_slice %7 {offsets = [0, 0], sizes = [16, 512], strides = [1, 1]} : vector<16x2048xf32> to vector<16x512xf32>
    %9 = vector.extract_strided_slice %7 {offsets = [0, 512], sizes = [16, 512], strides = [1, 1]} : vector<16x2048xf32> to vector<16x512xf32>
    %10 = arith.maximumf %8, %9 : vector<16x512xf32>
    %11 = vector.extract_strided_slice %7 {offsets = [0, 1024], sizes = [16, 512], strides = [1, 1]} : vector<16x2048xf32> to vector<16x512xf32>
    %12 = vector.extract_strided_slice %7 {offsets = [0, 1536], sizes = [16, 512], strides = [1, 1]} : vector<16x2048xf32> to vector<16x512xf32>
    %13 = arith.maximumf %11, %12 : vector<16x512xf32>
    %14 = arith.maximumf %10, %13 : vector<16x512xf32>
    %15 = arith.truncf %14 : vector<16x512xf32> to vector<16x512xbf16>
    %c0_6 = arith.constant 0 : index
    %c0_7 = arith.constant 0 : index
    %16 = vector.load %arg5[%c0_6, %c0_7] : memref<512x1024xbf16, #tpu.memory_space<vmem>>, vector<512x1024xbf16>
    %cst_8 = arith.constant dense<0.000000e+00> : vector<16x1024xf32>
    %17 = tpu.matmul %15, %16, %cst_8 {dimension_numbers = #tpu.dot_dimension_numbers<[1], [0], [0], [1], [0, 0, 1, 1], [], []>} : vector<16x512xbf16>, vector<512x1024xbf16>, vector<16x1024xf32> -> vector<16x1024xf32>
    %c0_9 = arith.constant 0 : index
    %c0_10 = arith.constant 0 : index
    %18 = vector.load %arg6[%c0_9, %c0_10] : memref<1x1024xf32, #tpu.memory_space<vmem>>, vector<1x1024xf32>
    %19 = vector.broadcast %18 : vector<1x1024xf32> to vector<16x1024xf32>
    %20 = arith.addf %17, %19 : vector<16x1024xf32>
    %cst_11 = arith.constant 0.000000e+00 : f32
    %21 = vector.broadcast %cst_11 : f32 to vector<16x1024xf32>
    %22 = arith.maximumf %20, %21 : vector<16x1024xf32>
    %23 = vector.extract_strided_slice %22 {offsets = [0, 0], sizes = [16, 256], strides = [1, 1]} : vector<16x1024xf32> to vector<16x256xf32>
    %24 = vector.extract_strided_slice %22 {offsets = [0, 256], sizes = [16, 256], strides = [1, 1]} : vector<16x1024xf32> to vector<16x256xf32>
    %25 = arith.maximumf %23, %24 : vector<16x256xf32>
    %26 = vector.extract_strided_slice %22 {offsets = [0, 512], sizes = [16, 256], strides = [1, 1]} : vector<16x1024xf32> to vector<16x256xf32>
    %27 = vector.extract_strided_slice %22 {offsets = [0, 768], sizes = [16, 256], strides = [1, 1]} : vector<16x1024xf32> to vector<16x256xf32>
    %28 = arith.maximumf %26, %27 : vector<16x256xf32>
    %29 = arith.maximumf %25, %28 : vector<16x256xf32>
    %30 = arith.truncf %29 : vector<16x256xf32> to vector<16x256xbf16>
    %c0_12 = arith.constant 0 : index
    %c0_13 = arith.constant 0 : index
    %31 = vector.load %arg7[%c0_12, %c0_13] : memref<256x128xbf16, #tpu.memory_space<vmem>>, vector<256x128xbf16>
    %cst_14 = arith.constant dense<0.000000e+00> : vector<16x128xf32>
    %32 = tpu.matmul %30, %31, %cst_14 {dimension_numbers = #tpu.dot_dimension_numbers<[1], [0], [0], [1], [0, 0, 1, 1], [], []>} : vector<16x256xbf16>, vector<256x128xbf16>, vector<16x128xf32> -> vector<16x128xf32>
    %c0_15 = arith.constant 0 : index
    %c0_16 = arith.constant 0 : index
    %33 = vector.load %arg2[%c0_15, %c0_16] : memref<16x5xbf16, #tpu.memory_space<vmem>>, vector<16x5xbf16>
    %c0_17 = arith.constant 0 : index
    %c0_18 = arith.constant 0 : index
    %34 = vector.load %arg8[%c0_17, %c0_18] : memref<5x128xbf16, #tpu.memory_space<vmem>>, vector<5x128xbf16>
    %cst_19 = arith.constant dense<0.000000e+00> : vector<16x128xf32>
    %35 = tpu.matmul %33, %34, %cst_19 {dimension_numbers = #tpu.dot_dimension_numbers<[1], [0], [0], [1], [0, 0, 1, 1], [], []>} : vector<16x5xbf16>, vector<5x128xbf16>, vector<16x128xf32> -> vector<16x128xf32>
    %36 = arith.addf %32, %35 : vector<16x128xf32>
    %c0_20 = arith.constant 0 : index
    %c0_21 = arith.constant 0 : index
    %37 = vector.load %arg9[%c0_20, %c0_21] : memref<1x128xf32, #tpu.memory_space<vmem>>, vector<1x128xf32>
    %38 = vector.broadcast %37 : vector<1x128xf32> to vector<16x128xf32>
    %39 = arith.addf %36, %38 : vector<16x128xf32>
    %cst_22 = arith.constant 0.000000e+00 : f32
    %40 = vector.broadcast %cst_22 : f32 to vector<16x128xf32>
    %41 = arith.maximumf %39, %40 : vector<16x128xf32>
    %42 = arith.truncf %41 : vector<16x128xf32> to vector<16x128xbf16>
    %c0_23 = arith.constant 0 : index
    %c0_24 = arith.constant 0 : index
    %43 = vector.load %arg10[%c0_23, %c0_24] : memref<128x64xbf16, #tpu.memory_space<vmem>>, vector<128x64xbf16>
    %cst_25 = arith.constant dense<0.000000e+00> : vector<16x64xf32>
    %44 = tpu.matmul %42, %43, %cst_25 {dimension_numbers = #tpu.dot_dimension_numbers<[1], [0], [0], [1], [0, 0, 1, 1], [], []>} : vector<16x128xbf16>, vector<128x64xbf16>, vector<16x64xf32> -> vector<16x64xf32>
    %c0_26 = arith.constant 0 : index
    %c0_27 = arith.constant 0 : index
    %45 = vector.load %arg11[%c0_26, %c0_27] : memref<1x64xf32, #tpu.memory_space<vmem>>, vector<1x64xf32>
    %46 = vector.broadcast %45 : vector<1x64xf32> to vector<16x64xf32>
    %47 = arith.addf %44, %46 : vector<16x64xf32>
    %cst_28 = arith.constant 0.000000e+00 : f32
    %48 = vector.broadcast %cst_28 : f32 to vector<16x64xf32>
    %49 = arith.maximumf %47, %48 : vector<16x64xf32>
    %c0_29 = arith.constant 0 : index
    %c0_30 = arith.constant 0 : index
    %50 = vector.load %arg12[%c0_29, %c0_30] : memref<8x64xbf16, #tpu.memory_space<vmem>>, vector<8x64xbf16>
    %51 = arith.truncf %49 : vector<16x64xf32> to vector<16x64xbf16>
    %cst_31 = arith.constant dense<0.000000e+00> : vector<8x16xf32>
    %52 = tpu.matmul %50, %51, %cst_31 {dimension_numbers = #tpu.dot_dimension_numbers<[1], [1], [0], [0], [0, 0, 1, 0], [], []>} : vector<8x64xbf16>, vector<16x64xbf16>, vector<8x16xf32> -> vector<8x16xf32>
    %53 = vector.extract_strided_slice %52 {offsets = [0, 0], sizes = [1, 16], strides = [1, 1]} : vector<8x16xf32> to vector<1x16xf32>
    %c0_32 = arith.constant 0 : index
    %c0_33 = arith.constant 0 : index
    %54 = vector.load %arg13[%c0_32, %c0_33] : memref<1x1xf32, #tpu.memory_space<vmem>>, vector<1x1xf32>
    %55 = vector.broadcast %54 : vector<1x1xf32> to vector<1x16xf32>
    %56 = arith.addf %53, %55 : vector<1x16xf32>
    %c0_34 = arith.constant 0 : index
    %c0_35 = arith.constant 0 : index
    %c0_36 = arith.constant 0 : index
    %57 = vector.load %arg14[%c0_34, %c0_35, %c0_36] : memref<1x1x16xf32, #tpu.memory_space<vmem>>, vector<1x1x16xf32>
    %58 = vector.shape_cast %57 : vector<1x1x16xf32> to vector<1x16xf32>
    %59 = vector.shape_cast %56 : vector<1x16xf32> to vector<1x1x16xf32>
    tpu.vector_store %arg14[%c0_34, %c0_35, %c0_36], %59 {strides = array<i32>} : memref<1x1x16xf32, #tpu.memory_space<vmem>>, vector<1x1x16xf32>,
    return
  }
  func.func @transform_0(%arg0: i32) -> (i32, i32) {
    %c0_i32 = arith.constant 0 : i32
    %c0_i32_0 = arith.constant 0 : i32
    return %arg0, %c0_i32 : i32, i32
  }
  func.func @transform_1(%arg0: i32) -> (i32, i32) {
    %c0_i32 = arith.constant 0 : i32
    %c0_i32_0 = arith.constant 0 : i32
    return %arg0, %c0_i32 : i32, i32
  }
  func.func @transform_2(%arg0: i32) -> (i32, i32) {
    %c0_i32 = arith.constant 0 : i32
    %c0_i32_0 = arith.constant 0 : i32
    %c0_i32_1 = arith.constant 0 : i32
    return %c0_i32, %c0_i32_0 : i32, i32
  }
  func.func @transform_3(%arg0: i32) -> (i32, i32) {
    %c0_i32 = arith.constant 0 : i32
    %c0_i32_0 = arith.constant 0 : i32
    %c0_i32_1 = arith.constant 0 : i32
    return %c0_i32, %c0_i32_0 : i32, i32
  }
  func.func @transform_4(%arg0: i32) -> (i32, i32) {
    %c0_i32 = arith.constant 0 : i32
    %c0_i32_0 = arith.constant 0 : i32
    %c0_i32_1 = arith.constant 0 : i32
    return %c0_i32, %c0_i32_0 : i32, i32
  }
  func.func @transform_5(%arg0: i32) -> (i32, i32) {
    %c0_i32 = arith.constant 0 : i32
    %c0_i32_0 = arith.constant 0 : i32
    %c0_i32_1 = arith.constant 0 : i32
    return %c0_i32, %c0_i32_0 : i32, i32
  }
  func.func @transform_6(%arg0: i32) -> (i32, i32) {
    %c0_i32 = arith.constant 0 : i32
    %c0_i32_0 = arith.constant 0 : i32
    %c0_i32_1 = arith.constant 0 : i32
    return %c0_i32, %c0_i32_0 : i32, i32
  }
  func.func @transform_7(%arg0: i32) -> (i32, i32) {
    %c0_i32 = arith.constant 0 : i32
    %c0_i32_0 = arith.constant 0 : i32
    %c0_i32_1 = arith.constant 0 : i32
    return %c0_i32, %c0_i32_0 : i32, i32
  }
  func.func @transform_8(%arg0: i32) -> (i32, i32) {
    %c0_i32 = arith.constant 0 : i32
    %c0_i32_0 = arith.constant 0 : i32
    %c0_i32_1 = arith.constant 0 : i32
    return %c0_i32, %c0_i32_0 : i32, i32
  }
  func.func @transform_9(%arg0: i32) -> (i32, i32) {
    %c0_i32 = arith.constant 0 : i32
    %c0_i32_0 = arith.constant 0 : i32
    %c0_i32_1 = arith.constant 0 : i32
    return %c0_i32, %c0_i32_0 : i32, i32
  }
  func.func @transform_10(%arg0: i32) -> (i32, i32) {
    %c0_i32 = arith.constant 0 : i32
    %c0_i32_0 = arith.constant 0 : i32
    %c0_i32_1 = arith.constant 0 : i32
    return %c0_i32, %c0_i32_0 : i32, i32
  }
  func.func @transform_11(%arg0: i32) -> (i32, i32) {
    %c0_i32 = arith.constant 0 : i32
    %c0_i32_0 = arith.constant 0 : i32
    %c0_i32_1 = arith.constant 0 : i32
    return %c0_i32, %c0_i32_0 : i32, i32
  }
  func.func @transform_12(%arg0: i32) -> (i32, i32) {
    %c0_i32 = arith.constant 0 : i32
    %c0_i32_0 = arith.constant 0 : i32
    %c0_i32_1 = arith.constant 0 : i32
    return %c0_i32, %c0_i32_0 : i32, i32
  }
  func.func @transform_13(%arg0: i32) -> (i32, i32, i32) {
    %c0_i32 = arith.constant 0 : i32
    %c0_i32_0 = arith.constant 0 : i32
    %c0_i32_1 = arith.constant 0 : i32
    return %arg0, %c0_i32, %c0_i32_0 : i32, i32, i32
  }
}

</mosaic_0001>

<bundles_post_ra>
// kernel: nnet_forward.1
= control target key start
LH: loop header
LB: loop body
LE: loop exit
PB: predicated region body
PF: predicated region fallthrough
CT: control target
= control target key end

     0   :  { %s4307_s0 = inlined_call_operand.vmem [shape: bf16[16,64], index: 0, kind: input, shape index: {}]   ;;  %s4308_s1 = inlined_call_operand.vmem [shape: bf16[16,5], index: 1, kind: input, shape index: {}]   ;;  %s4309_s2 = inlined_call_operand.hbm [shape: bf16[64,2048], index: 2, kind: input, shape index: {}]   ;;  %s4310_s3 = inlined_call_operand.vmem [shape: f32[1,2048], index: 3, kind: input, shape index: {}]   ;;  %s4311_s4 = inlined_call_operand.hbm [shape: bf16[512,1024], index: 4, kind: input, shape index: {}]   ;;  %s4312_s5 = inlined_call_operand.vmem [shape: f32[1,1024], index: 5, kind: input, shape index: {}]   ;;  %s4313_s6 = inlined_call_operand.vmem [shape: bf16[256,128], index: 6, kind: input, shape index: {}]   ;;  %s4314_s7 = inlined_call_operand.vmem [shape: bf16[5,128], index: 7, kind: input, shape index: {}]   ;;  %s4315_s8 = inlined_call_operand.vmem [shape: f32[1,128], index: 8, kind: input, shape index: {}]   ;;  %s4316_s9 = inlined_call_operand.vmem [shape: bf16[128,64], index: 9, kind: input, shape index: {}]   ;;  %s4317_s10 = inlined_call_operand.vmem [shape: f32[1,64], index: 10, kind: input, shape index: {}]   ;;  %s4318_s11 = inlined_call_operand.vmem [shape: bf16[8,64], index: 11, kind: input, shape index: {}]   ;;  %s4319_s12 = inlined_call_operand.<no memory space> [shape: f32[1,1], index: 12, kind: input, shape index: {}]   ;;  %s4320_s13 = inlined_call_operand.hbm [shape: f32[1,1,16], index: 13, kind: output, shape index: {}]  }
   0x1   :  { %v18_v0 = vstv %s4319_s12 }
   0x2   :  { %19 = vst [vmem:[#allocation2] sm:$0x1] %v18_v0 }
   0x3   :  { %20 = vsyncpa [#allocation4], 0 }
   0x4   :  { %21 = vsyncpa [#allocation7], 0 }
   0x5   :  { %22 = vsyncpa [#allocation5], 0  ;;  %s3910_s27 = smov [#allocation3]   ;;  %s3838_s14 = scalar_lea.hbm %s4309_s2, 8192 }
   0x6   :  { %s32_s28 = sshll.u32 %s3910_s27, 4  ;;  %p3839_p0 = scmp.ne.s32.totalorder %s4309_s2, %s3838_s14  ;;  %s33_s28 = int_to_ptr.vmem [resolvable:$true] %s32_s28 }
   0x7   :  { %p3842_p1 = scmp.lt.u32.totalorder %s3838_s14, %s4309_s2 }
   0x9   :  { %p3844_p2 = pnand %p3842_p1, %p3839_p0 }
   0xb   :  { %3847 = shalt.err (!%p3844_p2)
}
   0xc   :  { %s3848_s12 = scalar_lea.vmem %s33_s28, 8192  ;;  %p3853_p4 = scmp.lt.s32.totalorder %s33_s28, %s33_s28 }
   0xd   :  { %p3849_p3 = scmp.ne.s32.totalorder %s33_s28, %s3848_s12  ;;  %p3854_p5 = scmp.lt.s32.totalorder %s3848_s12, %s3848_s12 }
   0xf   :  { %p3855_p6 = por %p3854_p5, %p3853_p4 }
  0x11   :  { %p3856_p7 = pnand %p3855_p6, %p3849_p3 }
  0x13   :  { %3859 = shalt.err (!%p3856_p7)
}
  0x14   :  { %s3911_s19 = smov 1024   ;;  %s3912_s20 = smov 64  }
  0x15   :  { %38 = dma.hbm_to_vmem [thread:$0]  %s4309_s2, 8192, %s33_s28, [#allocation4], %s3911_s19, %s3911_s19, %s3912_s20  }
  0x16   :  { %s3913_s23 = smov [#allocation6]   ;;  %s3860_s27 = scalar_lea.hbm %s4311_s4, 32768 }
  0x17   :  { %s46_s24 = sshll.u32 %s3913_s23, 4  ;;  %p3861_p8 = scmp.ne.s32.totalorder %s4311_s4, %s3860_s27  ;;  %s47_s24 = int_to_ptr.vmem [resolvable:$true] %s46_s24 }
  0x18   :  { %p3864_p9 = scmp.lt.u32.totalorder %s3860_s27, %s4311_s4 }
  0x1a   :  { %p3866_p10 = pnand %p3864_p9, %p3861_p8 }
  0x1c   :  { %3869 = shalt.err (!%p3866_p10)
}
  0x1d   :  { %s3870_s16 = scalar_lea.vmem %s47_s24, 32768  ;;  %p3875_p12 = scmp.lt.s32.totalorder %s47_s24, %s47_s24 }
  0x1e   :  { %p3871_p11 = scmp.ne.s32.totalorder %s47_s24, %s3870_s16  ;;  %p3876_p13 = scmp.lt.s32.totalorder %s3870_s16, %s3870_s16 }
  0x20   :  { %p3877_p0 = por %p3876_p13, %p3875_p12 }
  0x22   :  { %p3878_p1 = pnand %p3877_p0, %p3871_p11 }
  0x24   :  { %3881 = shalt.err (!%p3878_p1)
}
  0x25   :  { %s3914_s2 = smov 512   ;;  %s3915_s28 = smov 32  }
  0x26   :  { %52 = dma.hbm_to_vmem [thread:$0]  %s4311_s4, 32768, %s47_s24, [#allocation7], %s3914_s2, %s3914_s2, %s3915_s28  }
  0x27   :  { %3904 = dma.done.wait [#allocation4], 8192  }
  0x28   :  { %3905 = vsyncadd [#allocation4], 4294959104 }
  0x29   :  { %3906 = dma.done.wait [#allocation7], 32768  }
  0x2a   :  { %3907 = vsyncadd [#allocation7], 4294934528  ;;  %v3916_v1 = vmov 0   ;;  %v78_v2 = vld [vmem:[#allocation3] sm:$0xff]  ;;  %v79_v11 = vld [vmem:[#allocation3 + $0x8] sm:$0xff]  ;;  %vm551_vm0 = vcmask 523264  }
  0x2b   :  { %587 = vmatprep.mubr.bf16.mxu0 %v3916_v1  ;;  %630 = vmatprep.mubr.bf16.mxu1 %v3916_v1  ;;  %v86_v3 = vld [vmem:[#allocation3 + $0x40] sm:$0xff]  ;;  %v87_v12 = vld [vmem:[#allocation3 + $0x48] sm:$0xff]  ;;  %v80_v30 = vld [vmem:[#allocation3 + $0x10] sm:$0xff]  ;;  %vm2955_vm1 = vcmask 1041408   ;;  %vm2956_vm2 = vcmask 1042432   ;;  %vm3919_vm3 = vmmov 0  }
  0x2c   :  { %3811 = vset.pattern.permute.xlu0 %v3916_v1  ;;  %v94_v4 = vld [vmem:[#allocation3 + $0x80] sm:$0xff]  ;;  %v3345_v5 = vcombine.high %v78_v2, %v86_v3  ;;  %v3344_v6 = vcombine.low %v78_v2, %v86_v3  ;;  %v3347_v14 = vcombine.high %v79_v11, %v87_v12  ;;  %v3346_v15 = vcombine.low %v79_v11, %v87_v12  ;;  %v95_v18 = vld [vmem:[#allocation3 + $0x88] sm:$0xff]  ;;  %v88_v31 = vld [vmem:[#allocation3 + $0x50] sm:$0xff] }
  0x2d   :  { %v102_v7 = vld [vmem:[#allocation3 + $0xc0] sm:$0xff]  ;;  %v103_v19 = vld [vmem:[#allocation3 + $0xc8] sm:$0xff]  ;;  %v3349_v35 = vcombine.high %v80_v30, %v88_v31  ;;  %v81_v36 = vld [vmem:[#allocation3 + $0x18] sm:$0xff]  ;;  %v3348_v42 = vcombine.low %v80_v30, %v88_v31  ;;  %vm2951_vm4 = vcmask 39936   ;;  %vm3325_vm5 = vcmask 122880  }
  0x2e   :  { %v3361_v8 = vcombine.high %v94_v4, %v102_v7  ;;  %v110_v9 = vld [vmem:[#allocation3 + $0x100] sm:$0xff]  ;;  %555 = vmatprep.subr.bf16.mxu0 %v3345_v5  ;;  %v3360_v13 = vcombine.low %v94_v4, %v102_v7  ;;  %598 = vmatprep.subr.bf16.mxu1 %v3347_v14  ;;  %v3363_v21 = vcombine.high %v95_v18, %v103_v19  ;;  %v111_v22 = vld [vmem:[#allocation3 + $0x108] sm:$0xff]  ;;  %v89_v37 = vld [vmem:[#allocation3 + $0x58] sm:$0xff] }
  0x2f   :  { %v118_v10 = vld [vmem:[#allocation3 + $0x140] sm:$0xff]  ;;  %556 = vmatpush1.bf16.msra.mxu0 %v3344_v6  ;;  %v119_v23 = vld [vmem:[#allocation3 + $0x148] sm:$0xff]  ;;  %599 = vmatpush1.bf16.msra.mxu1 %v3346_v15  ;;  %v3362_v24 = vcombine.low %v95_v18, %v103_v19  ;;  %v96_v38 = vld [vmem:[#allocation3 + $0x90] sm:$0xff]  ;;  %v3351_v43 = vcombine.high %v81_v36, %v89_v37  ;;  %v3350_v49 = vcombine.low %v81_v36, %v89_v37 }
  0x30   :  { %557 = vmatprep.subr.bf16.mxu0 %v3361_v8  ;;  %v3377_v16 = vcombine.high %v110_v9, %v118_v10  ;;  %v126_v17 = vld [vmem:[#allocation3 + $0x180] sm:$0xff]  ;;  %v3376_v25 = vcombine.low %v110_v9, %v118_v10  ;;  %600 = vmatprep.subr.bf16.mxu1 %v3363_v21  ;;  %v3379_v26 = vcombine.high %v111_v22, %v119_v23  ;;  %v127_v28 = vld [vmem:[#allocation3 + $0x188] sm:$0xff]  ;;  %v104_v39 = vld [vmem:[#allocation3 + $0xd0] sm:$0xff] }
  0x31   :  { %v134_v20 = vld [vmem:[#allocation3 + $0x1c0] sm:$0xff]  ;;  %v135_v29 = vld [vmem:[#allocation3 + $0x1c8] sm:$0xff]  ;;  %v3378_v32 = vcombine.low %v111_v22, %v119_v23  ;;  %v3365_v44 = vcombine.high %v96_v38, %v104_v39  ;;  %v97_v45 = vld [vmem:[#allocation3 + $0x98] sm:$0xff]  ;;  %v3364_v50 = vcombine.low %v96_v38, %v104_v39 }
  0x32   :  { %v3393_v27 = vcombine.high %v126_v17, %v134_v20  ;;  %v3392_v33 = vcombine.low %v126_v17, %v134_v20  ;;  %v3395_v34 = vcombine.high %v127_v28, %v135_v29  ;;  %v4024_v40 = vld [vmem:[%s4307_s0] sm:$0xff]   ;;  %v3394_v41 = vcombine.low %v127_v28, %v135_v29  ;;  %v112_v47 = vld [vmem:[#allocation3 + $0x110] sm:$0xff]  ;;  %v83_v3 = vld [vmem:[#allocation3 + $0x28] sm:$0xff] }
  0x33   :  { %558 = vmatpush1.bf16.msra.mxu0 %v3360_v13  ;;  %601 = vmatpush1.bf16.msra.mxu1 %v3362_v24  ;;  %v105_v46 = vld [vmem:[#allocation3 + $0xd8] sm:$0xff]  ;;  %v120_v48 = vld [vmem:[#allocation3 + $0x150] sm:$0xff]  ;;  %v82_v61 = vld [vmem:[#allocation3 + $0x20] sm:$0xff] }
  0x34   :  { %559 = vmatprep.subr.bf16.mxu0 %v3377_v16  ;;  %602 = vmatprep.subr.bf16.mxu1 %v3379_v26  ;;  %v3367_v51 = vcombine.high %v97_v45, %v105_v46  ;;  %v3381_v52 = vcombine.high %v112_v47, %v120_v48  ;;  %v113_v53 = vld [vmem:[#allocation3 + $0x118] sm:$0xff]  ;;  %v128_v55 = vld [vmem:[#allocation3 + $0x190] sm:$0xff]  ;;  %v3366_v57 = vcombine.low %v97_v45, %v105_v46  ;;  %v90_v62 = vld [vmem:[#allocation3 + $0x60] sm:$0xff] }
  0x35   :  { %v121_v54 = vld [vmem:[#allocation3 + $0x158] sm:$0xff]  ;;  %v136_v56 = vld [vmem:[#allocation3 + $0x1d0] sm:$0xff]  ;;  %v3380_v60 = vcombine.low %v112_v47, %v120_v48  ;;  %v91_v4 = vld [vmem:[#allocation3 + $0x68] sm:$0xff]  ;;  %v3353_v9 = vcombine.high %v82_v61, %v90_v62  ;;  %v3352_v13 = vcombine.low %v82_v61, %v90_v62 }
  0x36   :  { %v129_v58 = vld [vmem:[#allocation3 + $0x198] sm:$0xff]  ;;  %v3383_v63 = vcombine.high %v113_v53, %v121_v54  ;;  %v3397_v0 = vcombine.high %v128_v55, %v136_v56  ;;  %v3382_v2 = vcombine.low %v113_v53, %v121_v54  ;;  %v3396_v5 = vcombine.low %v128_v55, %v136_v56  ;;  %v98_v6 = vld [vmem:[#allocation3 + $0xa0] sm:$0xff]  ;;  %v99_v11 = vld [vmem:[#allocation3 + $0xa8] sm:$0xff] }
  0x37   :  { %560 = vmatpush1.bf16.msra.mxu0 %v3376_v25  ;;  %603 = vmatpush1.bf16.msra.mxu1 %v3378_v32  ;;  %v137_v59 = vld [vmem:[#allocation3 + $0x1d8] sm:$0xff]  ;;  %v106_v7 = vld [vmem:[#allocation3 + $0xe0] sm:$0xff]  ;;  %v107_v12 = vld [vmem:[#allocation3 + $0xe8] sm:$0xff]  ;;  %v3355_v16 = vcombine.high %v83_v3, %v91_v4  ;;  %v3354_v18 = vcombine.low %v83_v3, %v91_v4 }
  0x38   :  { %561 = vmatprep.subr.bf16.mxu0 %v3393_v27  ;;  %604 = vmatprep.subr.bf16.mxu1 %v3395_v34  ;;  %v3399_v8 = vcombine.high %v129_v58, %v137_v59  ;;  %v3398_v10 = vcombine.low %v129_v58, %v137_v59  ;;  %v114_v14 = vld [vmem:[#allocation3 + $0x120] sm:$0xff]  ;;  %v3369_v17 = vcombine.high %v98_v6, %v106_v7  ;;  %v115_v19 = vld [vmem:[#allocation3 + $0x128] sm:$0xff]  ;;  %v84_v32 = vld [vmem:[#allocation3 + $0x30] sm:$0xff] }
  0x39   :  { %v122_v15 = vld [vmem:[#allocation3 + $0x160] sm:$0xff]  ;;  %v123_v20 = vld [vmem:[#allocation3 + $0x168] sm:$0xff]  ;;  %v3368_v21 = vcombine.low %v98_v6, %v106_v7  ;;  %v3371_v24 = vcombine.high %v99_v11, %v107_v12  ;;  %v3370_v26 = vcombine.low %v99_v11, %v107_v12  ;;  %v85_v38 = vld [vmem:[#allocation3 + $0x38] sm:$0xff] }
  0x3a   :  { %v130_v22 = vld [vmem:[#allocation3 + $0x1a0] sm:$0xff]  ;;  %v3385_v25 = vcombine.high %v114_v14, %v122_v15  ;;  %v3384_v27 = vcombine.low %v114_v14, %v122_v15  ;;  %v3387_v28 = vcombine.high %v115_v19, %v123_v20  ;;  %v131_v30 = vld [vmem:[#allocation3 + $0x1a8] sm:$0xff]  ;;  %v3386_v34 = vcombine.low %v115_v19, %v123_v20  ;;  %v93_v39 = vld [vmem:[#allocation3 + $0x78] sm:$0xff] }
  0x3b   :  { %562 = vmatpush1.bf16.msra.mxu0 %v3392_v33  ;;  %605 = vmatpush1.bf16.msra.mxu1 %v3394_v41  ;;  %v138_v23 = vld [vmem:[#allocation3 + $0x1e0] sm:$0xff]  ;;  %v139_v31 = vld [vmem:[#allocation3 + $0x1e8] sm:$0xff]  ;;  %v92_v33 = vld [vmem:[#allocation3 + $0x70] sm:$0xff]  ;;  %v3359_v45 = vcombine.high %v85_v38, %v93_v39 }
  0x3c   :  { %641 = vmatprep.subr.bf16.mxu0 %v3349_v35  ;;  %684 = vmatprep.subr.bf16.mxu1 %v3351_v43  ;;  %v3401_v29 = vcombine.high %v130_v22, %v138_v23  ;;  %v3400_v35 = vcombine.low %v130_v22, %v138_v23  ;;  %v3403_v36 = vcombine.high %v131_v30, %v139_v31  ;;  %v100_v41 = vld [vmem:[#allocation3 + $0xb0] sm:$0xff]  ;;  %v101_v47 = vld [vmem:[#allocation3 + $0xb8] sm:$0xff]  ;;  %v963_v3 = vld [vmem:[#allocation6 + $0x20] sm:$0xff] }
  0x3d   :  { %v3357_v37 = vcombine.high %v84_v32, %v92_v33  ;;  %v3402_v43 = vcombine.low %v131_v30, %v139_v31  ;;  %v109_v48 = vld [vmem:[#allocation3 + $0xf8] sm:$0xff]  ;;  %v140_v58 = vld [vmem:[#allocation3 + $0x1f0] sm:$0xff]  ;;  %v971_v14 = vld [vmem:[#allocation6 + $0x60] sm:$0xff] }
  0x3e   :  { %3408 = vmatmul.mubr.msk.bf16.vlgmr.msra.gmra.mrb[0].mxu0 %vm551_vm0, %v4024_v40  ;;  %3409 = vmatmul.mubr.msk.bf16.vlgmr.msra.gmra.mrb[0].mxu1 %vm551_vm0, %v4024_v40  ;;  %v3375_v53 = vcombine.high %v101_v47, %v109_v48  ;;  %v117_v55 = vld [vmem:[#allocation3 + $0x138] sm:$0xff]  ;;  %v3374_v59 = vcombine.low %v101_v47, %v109_v48  ;;  %v968_v15 = vld [vmem:[#allocation6 + $0x48] sm:$0xff]  ;;  %v979_v22 = vld [vmem:[#allocation6 + $0xa0] sm:$0xff] }
  0x3f   :  { %642 = vmatpush1.bf16.msra.mxu0 %v3348_v42  ;;  %673 = vmatprep.mubr.bf16.mxu0 %v3916_v1  ;;  %v108_v42 = vld [vmem:[#allocation3 + $0xf0] sm:$0xff]  ;;  %v125_v56 = vld [vmem:[#allocation3 + $0x178] sm:$0xff]  ;;  %v976_v23 = vld [vmem:[#allocation6 + $0x88] sm:$0xff] }
  0x40   :  { %643 = vmatprep.subr.bf16.mxu0 %v3365_v44  ;;  %685 = vmatpush1.bf16.msra.mxu1 %v3350_v49  ;;  %v3356_v44 = vcombine.low %v84_v32, %v92_v33  ;;  %v3373_v46 = vcombine.high %v100_v41, %v108_v42  ;;  %v116_v49 = vld [vmem:[#allocation3 + $0x130] sm:$0xff]  ;;  %v3391_v61 = vcombine.high %v117_v55, %v125_v56  ;;  %v984_v30 = vld [vmem:[#allocation6 + $0xc8] sm:$0xff] }
  0x41   :  { %716 = vmatprep.mubr.bf16.mxu1 %v3916_v1  ;;  %686 = vmatprep.subr.bf16.mxu1 %v3367_v51  ;;  %v3358_v51 = vcombine.low %v85_v38, %v93_v39  ;;  %v3390_v4 = vcombine.low %v117_v55, %v125_v56  ;;  %v988_v33 = vld [vmem:[#allocation6 + $0xe8] sm:$0xff] }
  0x42   :  { %v992_v39 = vld [vmem:[#allocation6 + $0x108] sm:$0xff] }
  0x43   :  { %644 = vmatpush1.bf16.msra.mxu0 %v3364_v50  ;;  %v124_v50 = vld [vmem:[#allocation3 + $0x170] sm:$0xff]  ;;  %v1000_v47 = vld [vmem:[#allocation6 + $0x148] sm:$0xff] }
  0x44   :  { %645 = vmatprep.subr.bf16.mxu0 %v3381_v52  ;;  %687 = vmatpush1.bf16.msra.mxu1 %v3366_v57  ;;  %v3372_v52 = vcombine.low %v100_v41, %v108_v42  ;;  %v3389_v54 = vcombine.high %v116_v49, %v124_v50  ;;  %v132_v57 = vld [vmem:[#allocation3 + $0x1b0] sm:$0xff]  ;;  %v996_v41 = vld [vmem:[#allocation6 + $0x128] sm:$0xff] }
  0x45   :  { %688 = vmatprep.subr.bf16.mxu1 %v3383_v63  ;;  %v3405_v62 = vcombine.high %v132_v57, %v140_v58  ;;  %v133_v63 = vld [vmem:[#allocation3 + $0x1b8] sm:$0xff]  ;;  %v3451_v42 = vcombine.high %v992_v39, %v996_v41  ;;  %v1008_v55 = vld [vmem:[#allocation6 + $0x188] sm:$0xff] }
  0x47   :  { %646 = vmatpush1.bf16.msra.mxu0 %v3380_v60  ;;  %v3388_v60 = vcombine.low %v116_v49, %v124_v50  ;;  %v1004_v49 = vld [vmem:[#allocation6 + $0x168] sm:$0xff] }
  0x48   :  { %647 = vmatprep.subr.bf16.mxu0 %v3397_v0  ;;  %689 = vmatpush1.bf16.msra.mxu1 %v3382_v2  ;;  %v141_v0 = vld [vmem:[#allocation3 + $0x1f8] sm:$0xff]  ;;  %v959_v2 = vld [vmem:[#allocation6] sm:$0xff] }
  0x49   :  { %690 = vmatprep.subr.bf16.mxu1 %v3399_v8  ;;  %v3407_v6 = vcombine.high %v133_v63, %v141_v0  ;;  %v3417_v7 = vcombine.high %v959_v2, %v963_v3  ;;  %v960_v8 = vld [vmem:[#allocation6 + $0x8] sm:$0xff] }
  0x4b   :  { %648 = vmatpush1.bf16.msra.mxu0 %v3396_v5  ;;  %v3404_v5 = vcombine.low %v132_v57, %v140_v58  ;;  %v1012_v57 = vld [vmem:[#allocation6 + $0x1a8] sm:$0xff] }
  0x4c   :  { %727 = vmatprep.subr.bf16.mxu0 %v3353_v9  ;;  %691 = vmatpush1.bf16.msra.mxu1 %v3398_v10  ;;  %v3406_v9 = vcombine.low %v133_v63, %v141_v0  ;;  %v3416_v10 = vcombine.low %v959_v2, %v963_v3  ;;  %v1016_v63 = vld [vmem:[#allocation6 + $0x1c8] sm:$0xff] }
  0x4d   :  { %770 = vmatprep.subr.bf16.mxu1 %v3355_v16  ;;  %v1020_v3 = vld [vmem:[#allocation6 + $0x1e8] sm:$0xff] }
  0x4e   :  { %3410 = vmatmul.mubr.msk.bf16.vlgmr.msra.gmra.mrb[4].mxu0 %vm551_vm0, %v4024_v40 }
  0x4f   :  { %728 = vmatpush1.bf16.msra.mxu0 %v3352_v13  ;;  %759 = vmatprep.mubr.bf16.mxu0 %v3916_v1  ;;  %v967_v13 = vld [vmem:[#allocation6 + $0x40] sm:$0xff] }
  0x50   :  { %729 = vmatprep.subr.bf16.mxu0 %v3369_v17  ;;  %3411 = vmatmul.mubr.msk.bf16.vlgmr.msra.gmra.mrb[4].mxu1 %vm551_vm0, %v4024_v40  ;;  %v3425_v16 = vcombine.high %v967_v13, %v971_v14  ;;  %v972_v17 = vld [vmem:[#allocation6 + $0x68] sm:$0xff] }
  0x51   :  { %771 = vmatpush1.bf16.msra.mxu1 %v3354_v18  ;;  %802 = vmatprep.mubr.bf16.mxu1 %v3916_v1  ;;  %v3424_v18 = vcombine.low %v967_v13, %v971_v14  ;;  %v3426_v19 = vcombine.low %v968_v15, %v972_v17  ;;  %v3427_v20 = vcombine.high %v968_v15, %v972_v17  ;;  %v1031_v13 = vld [vmem:[#allocation6 + $0x240] sm:$0xff]  ;;  %v1032_v15 = vld [vmem:[#allocation6 + $0x248] sm:$0xff] }
  0x52   :  { %772 = vmatprep.subr.bf16.mxu1 %v3371_v24  ;;  %v1035_v14 = vld [vmem:[#allocation6 + $0x260] sm:$0xff]  ;;  %v1036_v17 = vld [vmem:[#allocation6 + $0x268] sm:$0xff] }
  0x53   :  { %730 = vmatpush1.bf16.msra.mxu0 %v3368_v21  ;;  %v975_v21 = vld [vmem:[#allocation6 + $0x80] sm:$0xff] }
  0x54   :  { %731 = vmatprep.subr.bf16.mxu0 %v3385_v25  ;;  %v3433_v24 = vcombine.high %v975_v21, %v979_v22  ;;  %v980_v25 = vld [vmem:[#allocation6 + $0xa8] sm:$0xff] }
  0x55   :  { %773 = vmatpush1.bf16.msra.mxu1 %v3370_v26  ;;  %v3432_v26 = vcombine.low %v975_v21, %v979_v22  ;;  %v1039_v21 = vld [vmem:[#allocation6 + $0x280] sm:$0xff] }
  0x56   :  { %774 = vmatprep.subr.bf16.mxu1 %v3387_v28  ;;  %v983_v28 = vld [vmem:[#allocation6 + $0xc0] sm:$0xff] }
  0x57   :  { %732 = vmatpush1.bf16.msra.mxu0 %v3384_v27  ;;  %v3435_v27 = vcombine.high %v976_v23, %v980_v25  ;;  %v1043_v22 = vld [vmem:[#allocation6 + $0x2a0] sm:$0xff] }
  0x58   :  { %733 = vmatprep.subr.bf16.mxu0 %v3401_v29  ;;  %v987_v29 = vld [vmem:[#allocation6 + $0xe0] sm:$0xff] }
  0x59   :  { %775 = vmatpush1.bf16.msra.mxu1 %v3386_v34  ;;  %v3440_v31 = vcombine.low %v983_v28, %v987_v29  ;;  %v3441_v32 = vcombine.high %v983_v28, %v987_v29  ;;  %v991_v34 = vld [vmem:[#allocation6 + $0x100] sm:$0xff] }
  0x5a   :  { %776 = vmatprep.subr.bf16.mxu1 %v3403_v36  ;;  %v3442_v36 = vcombine.low %v984_v30, %v988_v33  ;;  %v1047_v28 = vld [vmem:[#allocation6 + $0x2c0] sm:$0xff] }
  0x5b   :  { %734 = vmatpush1.bf16.msra.mxu0 %v3400_v35  ;;  %v995_v35 = vld [vmem:[#allocation6 + $0x120] sm:$0xff] }
  0x5c   :  { %813 = vmatprep.subr.bf16.mxu0 %v3357_v37  ;;  %v3443_v37 = vcombine.high %v984_v30, %v988_v33  ;;  %v3449_v38 = vcombine.high %v991_v34, %v995_v35  ;;  %v1051_v29 = vld [vmem:[#allocation6 + $0x2e0] sm:$0xff]  ;;  %v1048_v30 = vld [vmem:[#allocation6 + $0x2c8] sm:$0xff] }
  0x5d   :  { %777 = vmatpush1.bf16.msra.mxu1 %v3402_v43  ;;  %v3448_v43 = vcombine.low %v991_v34, %v995_v35  ;;  %v1052_v33 = vld [vmem:[#allocation6 + $0x2e8] sm:$0xff]  ;;  %v1055_v34 = vld [vmem:[#allocation6 + $0x300] sm:$0xff] }
  0x5e   :  { %3412 = vmatmul.mubr.msk.bf16.vlgmr.msra.gmra.mrb[8].mxu0 %vm551_vm0, %v4024_v40  ;;  %856 = vmatprep.subr.bf16.mxu1 %v3359_v45  ;;  %v999_v45 = vld [vmem:[#allocation6 + $0x140] sm:$0xff] }
  0x5f   :  { %814 = vmatpush1.bf16.msra.mxu0 %v3356_v44  ;;  %845 = vmatprep.mubr.bf16.mxu0 %v3916_v1  ;;  %v3450_v44 = vcombine.low %v992_v39, %v996_v41  ;;  %v1059_v35 = vld [vmem:[#allocation6 + $0x320] sm:$0xff]  ;;  %v1056_v39 = vld [vmem:[#allocation6 + $0x308] sm:$0xff] }
  0x60   :  { %815 = vmatprep.subr.bf16.mxu0 %v3373_v46  ;;  %3413 = vmatmul.mubr.msk.bf16.vlgmr.msra.gmra.mrb[8].mxu1 %vm551_vm0, %v4024_v40  ;;  %v1003_v46 = vld [vmem:[#allocation6 + $0x160] sm:$0xff]  ;;  %v1060_v41 = vld [vmem:[#allocation6 + $0x328] sm:$0xff] }
  0x61   :  { %857 = vmatpush1.bf16.msra.mxu1 %v3358_v51  ;;  %888 = vmatprep.mubr.bf16.mxu1 %v3916_v1  ;;  %v964_v1 = vld [vmem:[#allocation6 + $0x28] sm:$0xff]  ;;  %v3457_v48 = vcombine.high %v999_v45, %v1003_v46  ;;  %v3456_v50 = vcombine.low %v999_v45, %v1003_v46  ;;  %v3458_v51 = vcombine.low %v1000_v47, %v1004_v49  ;;  %v1063_v45 = vld [vmem:[#allocation6 + $0x340] sm:$0xff] }
  0x62   :  { %858 = vmatprep.subr.bf16.mxu1 %v3375_v53  ;;  %v3419_v11 = vcombine.high %v960_v8, %v964_v1  ;;  %v3418_v12 = vcombine.low %v960_v8, %v964_v1  ;;  %v1007_v53 = vld [vmem:[#allocation6 + $0x180] sm:$0xff]  ;;  %v1024_v1 = vld [vmem:[#allocation6 + $0x208] sm:$0xff] }
  0x63   :  { %816 = vmatpush1.bf16.msra.mxu0 %v3372_v52  ;;  %v3459_v52 = vcombine.high %v1000_v47, %v1004_v49  ;;  %v1067_v46 = vld [vmem:[#allocation6 + $0x360] sm:$0xff]  ;;  %v1064_v47 = vld [vmem:[#allocation6 + $0x348] sm:$0xff] }
  0x64   :  { %817 = vmatprep.subr.bf16.mxu0 %v3389_v54  ;;  %v1011_v54 = vld [vmem:[#allocation6 + $0x1a0] sm:$0xff]  ;;  %v1068_v49 = vld [vmem:[#allocation6 + $0x368] sm:$0xff] }
  0x65   :  { %859 = vmatpush1.bf16.msra.mxu1 %v3374_v59  ;;  %v3465_v56 = vcombine.high %v1007_v53, %v1011_v54  ;;  %v3464_v58 = vcombine.low %v1007_v53, %v1011_v54  ;;  %v3466_v59 = vcombine.low %v1008_v55, %v1012_v57  ;;  %v1071_v53 = vld [vmem:[#allocation6 + $0x380] sm:$0xff] }
  0x66   :  { %860 = vmatprep.subr.bf16.mxu1 %v3391_v61  ;;  %v1015_v61 = vld [vmem:[#allocation6 + $0x1c0] sm:$0xff] }
  0x67   :  { %818 = vmatpush1.bf16.msra.mxu0 %v3388_v60  ;;  %v3467_v60 = vcombine.high %v1008_v55, %v1012_v57  ;;  %v1075_v54 = vld [vmem:[#allocation6 + $0x3a0] sm:$0xff]  ;;  %v1072_v55 = vld [vmem:[#allocation6 + $0x388] sm:$0xff] }
  0x68   :  { %819 = vmatprep.subr.bf16.mxu0 %v3405_v62  ;;  %v1019_v62 = vld [vmem:[#allocation6 + $0x1e0] sm:$0xff]  ;;  %v1076_v57 = vld [vmem:[#allocation6 + $0x3a8] sm:$0xff] }
  0x69   :  { %861 = vmatpush1.bf16.msra.mxu1 %v3390_v4  ;;  %v3472_v0 = vcombine.low %v1015_v61, %v1019_v62  ;;  %v3473_v2 = vcombine.high %v1015_v61, %v1019_v62  ;;  %v1023_v4 = vld [vmem:[#allocation6 + $0x200] sm:$0xff] }
  0x6a   :  { %862 = vmatprep.subr.bf16.mxu1 %v3407_v6  ;;  %v3474_v6 = vcombine.low %v1016_v63, %v1020_v3  ;;  %v1079_v61 = vld [vmem:[#allocation6 + $0x3c0] sm:$0xff] }
  0x6b   :  { %820 = vmatpush1.bf16.msra.mxu0 %v3404_v5  ;;  %v1027_v5 = vld [vmem:[#allocation6 + $0x220] sm:$0xff] }
  0x6c   :  { %2537 = vmatprep.subr.bf16.mxu0 %v3417_v7  ;;  %v3475_v7 = vcombine.high %v1016_v63, %v1020_v3  ;;  %v3481_v8 = vcombine.high %v1023_v4, %v1027_v5  ;;  %v1083_v62 = vld [vmem:[#allocation6 + $0x3e0] sm:$0xff]  ;;  %v1080_v63 = vld [vmem:[#allocation6 + $0x3c8] sm:$0xff] }
  0x6d   :  { %863 = vmatpush1.bf16.msra.mxu1 %v3406_v9  ;;  %v1028_v9 = vld [vmem:[#allocation6 + $0x228] sm:$0xff]  ;;  %v3536_v3 = vcombine.low %v1079_v61, %v1083_v62 }
  0x6e   :  { %3414 = vmatmul.mubr.msk.bf16.vlgmr.msra.gmra.mrb[12].mxu0 %vm551_vm0, %v4024_v40  ;;  %2623 = vmatprep.subr.bf16.mxu1 %v3419_v11  ;;  %v3480_v11 = vcombine.low %v1023_v4, %v1027_v5 }
  0x6f   :  { %2538 = vmatpush1.bf16.msra.mxu0 %v3416_v10  ;;  %v3483_v10 = vcombine.high %v1024_v1, %v1028_v9 }
  0x70   :  { %3415 = vmatmul.mubr.msk.bf16.vlgmr.msra.gmra.mrb[12].mxu1 %vm551_vm0, %v4024_v40  ;;  %2539 = vmatprep.subr.bf16.mxu0 %v3425_v16  ;;  %v3434_v40 = vcombine.low %v976_v23, %v980_v25  ;;  %v3489_v16 = vcombine.high %v1031_v13, %v1035_v14  ;;  %v1040_v23 = vld [vmem:[#allocation6 + $0x288] sm:$0xff] }
  0x71   :  { %2624 = vmatpush1.bf16.msra.mxu1 %v3418_v12  ;;  %v3482_v12 = vcombine.low %v1024_v1, %v1028_v9  ;;  %v1044_v25 = vld [vmem:[#allocation6 + $0x2a8] sm:$0xff] }
  0x72   :  { %2625 = vmatprep.subr.bf16.mxu1 %v3427_v20  ;;  %v3491_v20 = vcombine.high %v1032_v15, %v1036_v17  ;;  %v4056_v9 = vld [vmem:[#allocation6 + $0x428] sm:$0xff] }
  0x73   :  { %2540 = vmatpush1.bf16.msra.mxu0 %v3424_v18  ;;  %v3488_v18 = vcombine.low %v1031_v13, %v1035_v14  ;;  %v146_v13 = vlaneseq }
  0x74   :  { %2541 = vmatprep.subr.bf16.mxu0 %v3433_v24  ;;  %v3497_v24 = vcombine.high %v1039_v21, %v1043_v22 }
  0x75   :  { %2626 = vmatpush1.bf16.msra.mxu1 %v3426_v19  ;;  %v3490_v19 = vcombine.low %v1032_v15, %v1036_v17  ;;  %v147_v15 = vshrl.u32 %v146_v13, 7 }
  0x76   :  { %2627 = vmatprep.subr.bf16.mxu1 %v3435_v27  ;;  %v3499_v27 = vcombine.high %v1040_v23, %v1044_v25 }
  0x77   :  { %2542 = vmatpush1.bf16.msra.mxu0 %v3432_v26  ;;  %v3496_v26 = vcombine.low %v1039_v21, %v1043_v22  ;;  %v4064_v21 = vsub.s32 0, %v147_v15 }
  0x78   :  { %2543 = vmatprep.subr.bf16.mxu0 %v3441_v32  ;;  %v3505_v32 = vcombine.high %v1047_v28, %v1051_v29 }
  0x79   :  { %2628 = vmatpush1.bf16.msra.mxu1 %v3434_v40  ;;  %v3498_v40 = vcombine.low %v1040_v23, %v1044_v25  ;;  %v142_v23 = vld [vmem:[%s4310_s3] sm:$0xff] }
  0x7a   :  { %2629 = vmatprep.subr.bf16.mxu1 %v3443_v37  ;;  %v3507_v37 = vcombine.high %v1048_v30, %v1052_v33 }
  0x7b   :  { %2544 = vmatpush1.bf16.msra.mxu0 %v3440_v31  ;;  %v3504_v31 = vcombine.low %v1047_v28, %v1051_v29  ;;  %v4076_v28 = vsub.s32 4, %v147_v15 }
  0x7c   :  { %2545 = vmatprep.subr.bf16.mxu0 %v3449_v38  ;;  %v3513_v38 = vcombine.high %v1055_v34, %v1059_v35 }
  0x7d   :  { %2630 = vmatpush1.bf16.msra.mxu1 %v3442_v36  ;;  %v3506_v36 = vcombine.low %v1048_v30, %v1052_v33  ;;  %v4079_v30 = vsub.s32 5, %v147_v15  ;;  %v4083_v33 = vsub.s32 6, %v147_v15 }
  0x7e   :  { %2631 = vmatprep.subr.bf16.mxu1 %v3451_v42  ;;  %v3515_v42 = vcombine.high %v1056_v39, %v1060_v41 }
  0x7f   :  { %2546 = vmatpush1.bf16.msra.mxu0 %v3448_v43  ;;  %v3512_v43 = vcombine.low %v1055_v34, %v1059_v35  ;;  %v165_v35 = vrot.slane %v142_v23, %v4076_v28 }
  0x80   :  { %2547 = vmatprep.subr.bf16.mxu0 %v3457_v48  ;;  %v3521_v48 = vcombine.high %v1063_v45, %v1067_v46 }
  0x81   :  { %2632 = vmatpush1.bf16.msra.mxu1 %v3450_v44  ;;  %v3514_v44 = vcombine.low %v1056_v39, %v1060_v41  ;;  %v169_v41 = vrot.slane %v142_v23, %v4079_v30 }
  0x82   :  { %2633 = vmatprep.subr.bf16.mxu1 %v3459_v52  ;;  %v3523_v52 = vcombine.high %v1064_v47, %v1068_v49 }
  0x83   :  { %2548 = vmatpush1.bf16.msra.mxu0 %v3456_v50  ;;  %v3520_v50 = vcombine.low %v1063_v45, %v1067_v46  ;;  %v173_v45 = vrot.slane %v142_v23, %v4083_v33 }
  0x84   :  { %2549 = vmatprep.subr.bf16.mxu0 %v3465_v56  ;;  %v3529_v56 = vcombine.high %v1071_v53, %v1075_v54 }
  0x85   :  { %2634 = vmatpush1.bf16.msra.mxu1 %v3458_v51  ;;  %v3522_v51 = vcombine.low %v1064_v47, %v1068_v49 }
  0x86   :  { %2635 = vmatprep.subr.bf16.mxu1 %v3467_v60  ;;  %v3531_v60 = vcombine.high %v1072_v55, %v1076_v57 }
  0x87   :  { %2550 = vmatpush1.bf16.msra.mxu0 %v3464_v58  ;;  %v3528_v58 = vcombine.low %v1071_v53, %v1075_v54 }
  0x88   :  { %2551 = vmatprep.subr.bf16.mxu0 %v3473_v2  ;;  %v1084_v2 = vld [vmem:[#allocation6 + $0x3e8] sm:$0xff] }
  0x89   :  { %2636 = vmatpush1.bf16.msra.mxu1 %v3466_v59  ;;  %v3530_v59 = vcombine.low %v1072_v55, %v1076_v57  ;;  %v3538_v4 = vcombine.low %v1080_v63, %v1084_v2  ;;  %v3539_v5 = vcombine.high %v1080_v63, %v1084_v2 }
  0x8a   :  { %2637 = vmatprep.subr.bf16.mxu1 %v3475_v7  ;;  %v4050_v7 = vld [vmem:[#allocation6 + $0x420] sm:$0xff] }
  0x8b   :  { %2552 = vmatpush1.bf16.msra.mxu0 %v3472_v0  ;;  %v3537_v0 = vcombine.high %v1079_v61, %v1083_v62 }
  0x8c   :  { %2553 = vmatprep.subr.bf16.mxu0 %v3481_v8  ;;  %v4052_v8 = vld [vmem:[#allocation6 + $0x408] sm:$0xff] }
  0x8d   :  { %2638 = vmatpush1.bf16.msra.mxu1 %v3474_v6  ;;  %v4048_v6 = vld [vmem:[#allocation6 + $0x400] sm:$0xff] }
  0x8e   :  { %2639 = vmatprep.subr.bf16.mxu1 %v3483_v10  ;;  %v3545_v1 = vcombine.high %v4048_v6, %v4050_v7  ;;  %v3544_v10 = vcombine.low %v4048_v6, %v4050_v7 }
  0x8f   :  { %2554 = vmatpush1.bf16.msra.mxu0 %v3480_v11  ;;  %v3546_v11 = vcombine.low %v4052_v8, %v4056_v9 }
  0x90   :  { %2555 = vmatprep.subr.bf16.mxu0 %v3489_v16 }
  0x91   :  { %2640 = vmatpush1.bf16.msra.mxu1 %v3482_v12  ;;  %v3547_v12 = vcombine.high %v4052_v8, %v4056_v9 }
  0x92   :  { %2641 = vmatprep.subr.bf16.mxu1 %v3491_v20 }
  0x93   :  { %2556 = vmatpush1.bf16.msra.mxu0 %v3488_v18 }
  0x94   :  { %2557 = vmatprep.subr.bf16.mxu0 %v3497_v24  ;;  %v4069_v24 = vsub.s32 1, %v147_v15 }
  0x95   :  { %2642 = vmatpush1.bf16.msra.mxu1 %v3490_v19 }
  0x96   :  { %2643 = vmatprep.subr.bf16.mxu1 %v3499_v27  ;;  %v149_v27 = vrot.slane %v142_v23, %v4064_v21  ;;  %v153_v29 = vrot.slane %v142_v23, %v4069_v24 }
  0x97   :  { %2558 = vmatpush1.bf16.msra.mxu0 %v3496_v26  ;;  %v4071_v26 = vsub.s32 2, %v147_v15 }
  0x98   :  { %2559 = vmatprep.subr.bf16.mxu0 %v3505_v32 }
  0x99   :  { %2644 = vmatpush1.bf16.msra.mxu1 %v3498_v40  ;;  %v4073_v40 = vsub.s32 3, %v147_v15 }
  0x9a   :  { %2645 = vmatprep.subr.bf16.mxu1 %v3507_v37 }
  0x9b   :  { %2560 = vmatpush1.bf16.msra.mxu0 %v3504_v31  ;;  %v157_v31 = vrot.slane %v142_v23, %v4071_v26  ;;  %v161_v32 = vrot.slane %v142_v23, %v4073_v40 }
  0x9c   :  { %2561 = vmatprep.subr.bf16.mxu0 %v3513_v38 }
  0x9d   :  { %2646 = vmatpush1.bf16.msra.mxu1 %v3506_v36  ;;  %v4086_v36 = vsub.s32 7, %v147_v15 }
  0x9e   :  { %2647 = vmatprep.subr.bf16.mxu1 %v3515_v42 }
  0x9f   :  { %2562 = vmatpush1.bf16.msra.mxu0 %v3512_v43 }
  0xa0   :  { %2563 = vmatprep.subr.bf16.mxu0 %v3521_v48 }
  0xa1   :  { %2648 = vmatpush1.bf16.msra.mxu1 %v3514_v44 }
  0xa2   :  { %2649 = vmatprep.subr.bf16.mxu1 %v3523_v52 }
  0xa3   :  { %2564 = vmatpush1.bf16.msra.mxu0 %v3520_v50  ;;  %v177_v50 = vrot.slane %v142_v23, %v4086_v36 }
  0xa4   :  { %2565 = vmatprep.subr.bf16.mxu0 %v3529_v56 }
  0xa5   :  { %2650 = vmatpush1.bf16.msra.mxu1 %v3522_v51 }
  0xa6   :  { %2651 = vmatprep.subr.bf16.mxu1 %v3531_v60 }
  0xa7   :  { %2566 = vmatpush1.bf16.msra.mxu0 %v3528_v58 }
  0xa8   :  { %2567 = vmatprep.subr.bf16.mxu0 %v3537_v0 }
  0xa9   :  { %2652 = vmatpush1.bf16.msra.mxu1 %v3530_v59 }
  0xaa   :  { %2653 = vmatprep.subr.bf16.mxu1 %v3539_v5 }
  0xab   :  { %2568 = vmatpush1.bf16.msra.mxu0 %v3536_v3 }
  0xac   :  { %2580 = vmatprep.subr.bf16.mxu0 %v3545_v1 }
  0xad   :  { %2654 = vmatpush1.bf16.msra.mxu1 %v3538_v4 }
  0xae   :  { %2666 = vmatprep.subr.bf16.mxu1 %v3547_v12 }
 0x111   :  { %v589_v14 = vpop.f32.mrb[0].mxu0  ;;  %v632_v19 = vpop.f32.mrb[0].mxu1 }
 0x112   :  { %v591_v16 = vpop.f32.mrb[1].mxu0  ;;  %v634_v20 = vpop.f32.mrb[1].mxu1  ;;  %v590_v34 = vadd.f32 %v589_v14, %v149_v27  ;;  %v633_v42 = vadd.f32 %v632_v19, %v157_v31 }
 0x113   :  { %v593_v17 = vpop.f32.mrb[2].mxu0  ;;  %v636_v22 = vpop.f32.mrb[2].mxu1  ;;  %v592_v37 = vadd.f32 %v591_v16, %v153_v29  ;;  %v635_v44 = vadd.f32 %v634_v20, %v161_v32 }
 0x114   :  { %v595_v18 = vpop.f32.mrb[3].mxu0  ;;  %v638_v25 = vpop.f32.mrb[3].mxu1  ;;  %v594_v38 = vadd.f32 %v593_v17, %v149_v27  ;;  %v899_v46 = vmax.f32 %v590_v34, 0.0  ;;  %v637_v49 = vadd.f32 %v636_v22, %v157_v31  ;;  %v901_v59 = vmax.f32 %v633_v42, 0.0 }
 0x115   :  { %v596_v39 = vadd.f32 %v595_v18, %v153_v29  ;;  %v900_v51 = vmax.f32 %v592_v37, 0.0  ;;  %v639_v60 = vadd.f32 %v638_v25, %v161_v32  ;;  %v902_v0 = vmax.f32 %v635_v44, 0.0  ;;  %v143_v37 = vld [vmem:[%s4310_s3 + $0x8] sm:$0xff] }
 0x116   :  { %v915_v52 = vmax.f32 %v594_v38, 0.0  ;;  %v917_v1 = vmax.f32 %v637_v49, 0.0 }
 0x117   :  { %v916_v53 = vmax.f32 %v596_v39, 0.0  ;;  %v918_v20 = vmax.f32 %v639_v60, 0.0  ;;  %v189_v39 = vrot.slane %v143_v37, %v4071_v26 }
 0x121   :  { %v675_v43 = vpop.f32.mrb[4].mxu0 }
 0x122   :  { %v676_v47 = vadd.f32 %v675_v43, %v165_v35  ;;  %v677_v48 = vpop.f32.mrb[5].mxu0 }
 0x123   :  { %v678_v54 = vadd.f32 %v677_v48, %v169_v41  ;;  %v679_v55 = vpop.f32.mrb[6].mxu0  ;;  %v718_v61 = vpop.f32.mrb[4].mxu1 }
 0x124   :  { %v903_v56 = vmax.f32 %v676_v47, 0.0  ;;  %v680_v57 = vadd.f32 %v679_v55, %v165_v35  ;;  %v681_v58 = vpop.f32.mrb[7].mxu0  ;;  %v719_v2 = vadd.f32 %v718_v61, %v173_v45  ;;  %v720_v3 = vpop.f32.mrb[5].mxu1  ;;  %v205_v61 = vrot.slane %v143_v37, %v4083_v33 }
 0x125   :  { %v904_v62 = vmax.f32 %v678_v54, 0.0  ;;  %v682_v63 = vadd.f32 %v681_v58, %v169_v41  ;;  %v721_v12 = vadd.f32 %v720_v3, %v177_v50  ;;  %v722_v13 = vpop.f32.mrb[6].mxu1  ;;  %v197_v54 = vrot.slane %v143_v37, %v4076_v28 }
 0x126   :  { %v4091_v4 = vmax.f32 %v899_v46, %v903_v56  ;;  %v919_v5 = vmax.f32 %v680_v57, 0.0  ;;  %v905_v16 = vmax.f32 %v719_v2, 0.0  ;;  %v723_v17 = vadd.f32 %v722_v13, %v173_v45  ;;  %v724_v18 = vpop.f32.mrb[7].mxu1 }
 0x127   :  { %v4093_v14 = vmax.f32 %v900_v51, %v904_v62  ;;  %v920_v15 = vmax.f32 %v682_v63, 0.0  ;;  %v906_v22 = vmax.f32 %v721_v12, 0.0  ;;  %v725_v23 = vadd.f32 %v724_v18, %v177_v50 }
 0x128   :  { %v4095_v19 = vmax.f32 %v915_v52, %v919_v5  ;;  %v4099_v27 = vmax.f32 %v901_v59, %v905_v16  ;;  %v921_v29 = vmax.f32 %v723_v17, 0.0  ;;  %v181_v50 = vrot.slane %v143_v37, %v4064_v21 }
 0x129   :  { %v4097_v25 = vmax.f32 %v916_v53, %v920_v15  ;;  %v4101_v31 = vmax.f32 %v902_v0, %v906_v22  ;;  %v922_v32 = vmax.f32 %v725_v23, 0.0  ;;  %v185_v51 = vrot.slane %v143_v37, %v4069_v24 }
 0x12a   :  { %v4103_v34 = vmax.f32 %v917_v1, %v921_v29  ;;  %v193_v52 = vrot.slane %v143_v37, %v4073_v40  ;;  %v201_v58 = vrot.slane %v143_v37, %v4079_v30  ;;  %v209_v3 = vrot.slane %v143_v37, %v4086_v36 }
 0x12b   :  { %v4105_v35 = vmax.f32 %v918_v20, %v922_v32 }
 0x131   :  { %v761_v38 = vpop.f32.mrb[8].mxu0 }
 0x132   :  { %v763_v41 = vpop.f32.mrb[9].mxu0  ;;  %v762_v53 = vadd.f32 %v761_v38, %v181_v50 }
 0x133   :  { %v765_v42 = vpop.f32.mrb[10].mxu0  ;;  %v804_v44 = vpop.f32.mrb[8].mxu1  ;;  %v764_v55 = vadd.f32 %v763_v41, %v185_v51 }
 0x134   :  { %v767_v43 = vpop.f32.mrb[11].mxu0  ;;  %v805_v45 = vadd.f32 %v804_v44, %v189_v39  ;;  %v806_v46 = vpop.f32.mrb[9].mxu1  ;;  %v766_v56 = vadd.f32 %v765_v42, %v181_v50  ;;  %v907_v62 = vmax.f32 %v762_v53, 0.0 }
 0x135   :  { %v808_v47 = vpop.f32.mrb[10].mxu1  ;;  %v768_v57 = vadd.f32 %v767_v43, %v185_v51  ;;  %v807_v59 = vadd.f32 %v806_v46, %v193_v52  ;;  %v908_v5 = vmax.f32 %v764_v55, 0.0 }
 0x136   :  { %v809_v48 = vadd.f32 %v808_v47, %v189_v39  ;;  %v810_v49 = vpop.f32.mrb[11].mxu1  ;;  %v923_v1 = vmax.f32 %v766_v56, 0.0  ;;  %v909_v20 = vmax.f32 %v805_v45, 0.0 }
 0x137   :  { %v811_v2 = vadd.f32 %v810_v49, %v193_v52  ;;  %v924_v12 = vmax.f32 %v768_v57, 0.0  ;;  %v910_v22 = vmax.f32 %v807_v59, 0.0 }
 0x138   :  { %v925_v38 = vmax.f32 %v809_v48, 0.0 }
 0x139   :  { %v926_v44 = vmax.f32 %v811_v2, 0.0 }
 0x141   :  { %v847_v60 = vpop.f32.mrb[12].mxu0 }
 0x142   :  { %v848_v63 = vadd.f32 %v847_v60, %v197_v54  ;;  %v849_v0 = vpop.f32.mrb[13].mxu0 }
 0x143   :  { %v850_v13 = vadd.f32 %v849_v0, %v201_v58  ;;  %v851_v15 = vpop.f32.mrb[14].mxu0  ;;  %v890_v23 = vpop.f32.mrb[12].mxu1 }
 0x144   :  { %v911_v16 = vmax.f32 %v848_v63, 0.0  ;;  %v852_v17 = vadd.f32 %v851_v15, %v197_v54  ;;  %v853_v18 = vpop.f32.mrb[15].mxu0  ;;  %v891_v39 = vadd.f32 %v890_v23, %v205_v61  ;;  %v892_v41 = vpop.f32.mrb[13].mxu1  ;;  %v1095_v63 = vld [vmem:[#allocation6 + $0x440] sm:$0xff] }
 0x145   :  { %v912_v29 = vmax.f32 %v850_v13, 0.0  ;;  %v854_v32 = vadd.f32 %v853_v18, %v201_v58  ;;  %v893_v37 = vadd.f32 %v892_v41, %v209_v3  ;;  %v894_v46 = vpop.f32.mrb[14].mxu1  ;;  %v1107_v18 = vld [vmem:[#allocation6 + $0x4a0] sm:$0xff]  ;;  %v1116_v41 = vld [vmem:[#allocation6 + $0x4e8] sm:$0xff] }
 0x146   :  { %v939_v42 = vmax.f32 %v907_v62, %v911_v16  ;;  %v927_v43 = vmax.f32 %v852_v17, 0.0  ;;  %v913_v50 = vmax.f32 %v891_v39, 0.0  ;;  %v895_v51 = vadd.f32 %v894_v46, %v205_v61  ;;  %v896_v52 = vpop.f32.mrb[15].mxu1  ;;  %v1112_v39 = vld [vmem:[#allocation6 + $0x4c8] sm:$0xff] }
 0x147   :  { %v940_v47 = vmax.f32 %v908_v5, %v912_v29  ;;  %v928_v49 = vmax.f32 %v854_v32, 0.0  ;;  %v914_v54 = vmax.f32 %v893_v37, 0.0  ;;  %v897_v55 = vadd.f32 %v896_v52, %v209_v3  ;;  %v1099_v5 = vld [vmem:[#allocation6 + $0x460] sm:$0xff]  ;;  %v1132_v52 = vld [vmem:[#allocation6 + $0x568] sm:$0xff] }
 0x148   :  { %v947_v53 = vmax.f32 %v4091_v4, %v939_v42  ;;  %v943_v45 = vmax.f32 %v923_v1, %v927_v43  ;;  %v941_v57 = vmax.f32 %v909_v20, %v913_v50  ;;  %v929_v58 = vmax.f32 %v895_v51, 0.0  ;;  %v1096_v4 = vld [vmem:[#allocation6 + $0x448] sm:$0xff]  ;;  %v1111_v32 = vld [vmem:[#allocation6 + $0x4c0] sm:$0xff] }
 0x149   :  { %v948_v56 = vmax.f32 %v4093_v14, %v940_v47  ;;  %v944_v48 = vmax.f32 %v924_v12, %v928_v49  ;;  %v942_v60 = vmax.f32 %v910_v22, %v914_v54  ;;  %v930_v62 = vmax.f32 %v897_v55, 0.0  ;;  %v1100_v1 = vld [vmem:[#allocation6 + $0x468] sm:$0xff]  ;;  %v1127_v49 = vld [vmem:[#allocation6 + $0x540] sm:$0xff] }
 0x14a   :  { %v951_v59 = vmax.f32 %v4095_v19, %v943_v45  ;;  %v949_v61 = vmax.f32 %v4099_v27, %v941_v57  ;;  %v945_v2 = vmax.f32 %v925_v38, %v929_v58  ;;  %v3553_v16 = vcombine.high %v1095_v63, %v1099_v5  ;;  %v1104_v20 = vld [vmem:[#allocation6 + $0x488] sm:$0xff]  ;;  %v1115_v38 = vld [vmem:[#allocation6 + $0x4e0] sm:$0xff] }
 0x14b   :  { %v952_v0 = vmax.f32 %v4097_v25, %v944_v48  ;;  %v950_v14 = vmax.f32 %v4101_v31, %v942_v60  ;;  %v946_v3 = vmax.f32 %v926_v44, %v930_v62  ;;  %v3555_v17 = vcombine.high %v1096_v4, %v1100_v1  ;;  %v1103_v25 = vld [vmem:[#allocation6 + $0x480] sm:$0xff]  ;;  %v1108_v22 = vld [vmem:[#allocation6 + $0x4a8] sm:$0xff] }
 0x14c   :  { %v4123_v13 = vpack.c.bf16 %v951_v59, %v947_v53  ;;  %v953_v19 = vmax.f32 %v4103_v34, %v945_v2  ;;  %v3552_v34 = vcombine.low %v1095_v63, %v1099_v5  ;;  %v3561_v23 = vcombine.high %v1103_v25, %v1107_v18  ;;  %v1120_v42 = vld [vmem:[#allocation6 + $0x508] sm:$0xff]  ;;  %v1131_v50 = vld [vmem:[#allocation6 + $0x560] sm:$0xff] }
 0x14d   :  { %v4126_v12 = vpack.c.bf16 %v952_v0, %v948_v56  ;;  %v954_v15 = vmax.f32 %v4105_v35, %v946_v3  ;;  %v3554_v35 = vcombine.low %v1096_v4, %v1100_v1  ;;  %v3563_v29 = vcombine.high %v1104_v20, %v1108_v22  ;;  %v1124_v43 = vld [vmem:[#allocation6 + $0x528] sm:$0xff]  ;;  %v1135_v56 = vld [vmem:[#allocation6 + $0x580] sm:$0xff] }
 0x14e   :  { %v4132_v27 = vpack.c.bf16 %v953_v19, %v949_v61  ;;  %v3560_v6 = vcombine.low %v1103_v25, %v1107_v18  ;;  %v3562_v7 = vcombine.low %v1104_v20, %v1108_v22  ;;  %v3569_v8 = vcombine.high %v1111_v32, %v1115_v38  ;;  %v1128_v51 = vld [vmem:[#allocation6 + $0x548] sm:$0xff]  ;;  %v1139_v48 = vld [vmem:[#allocation6 + $0x5a0] sm:$0xff] }
 0x14f   :  { %2569 = vmatprep.mubr.bf16.mxu0 %v4126_v12  ;;  %2655 = vmatprep.mubr.bf16.mxu1 %v4126_v12  ;;  %v4136_v31 = vpack.c.bf16 %v954_v15, %v950_v14  ;;  %v3571_v9 = vcombine.high %v1112_v39, %v1116_v41  ;;  %v3568_v44 = vcombine.low %v1111_v32, %v1115_v38  ;;  %v1136_v57 = vld [vmem:[#allocation6 + $0x588] sm:$0xff]  ;;  %v1143_v0 = vld [vmem:[#allocation6 + $0x5c0] sm:$0xff] }
 0x150   :  { %2570 = vmatmul.mubr.bf16.vlgmr.msra.gmra.mrb[16].mxu0 %v4123_v13  ;;  %2656 = vmatmul.mubr.bf16.vlgmr.msra.gmra.mrb[16].mxu1 %v4123_v13  ;;  %v3570_v37 = vcombine.low %v1112_v39, %v1116_v41  ;;  %v3579_v47 = vcombine.high %v1120_v42, %v1124_v43  ;;  %v3578_v45 = vcombine.low %v1120_v42, %v1124_v43  ;;  %v1140_v58 = vld [vmem:[#allocation6 + $0x5a8] sm:$0xff]  ;;  %v1147_v61 = vld [vmem:[#allocation6 + $0x5e0] sm:$0xff] }
 0x151   :  { %2581 = vmatpush1.bf16.msra.mxu0 %v3544_v10  ;;  %2667 = vmatpush1.bf16.msra.mxu1 %v3546_v11  ;;  %v1119_v10 = vld [vmem:[#allocation6 + $0x500] sm:$0xff]  ;;  %v3585_v54 = vcombine.high %v1127_v49, %v1131_v50  ;;  %v3587_v55 = vcombine.high %v1128_v51, %v1132_v52  ;;  %v3584_v59 = vcombine.low %v1127_v49, %v1131_v50  ;;  %v1144_v2 = vld [vmem:[#allocation6 + $0x5c8] sm:$0xff] }
 0x152   :  { %2582 = vmatprep.subr.bf16.mxu0 %v3553_v16  ;;  %2668 = vmatprep.subr.bf16.mxu1 %v3555_v17  ;;  %v1123_v11 = vld [vmem:[#allocation6 + $0x520] sm:$0xff]  ;;  %v3586_v60 = vcombine.low %v1128_v51, %v1132_v52  ;;  %v3593_v62 = vcombine.high %v1135_v56, %v1139_v48  ;;  %v3595_v63 = vcombine.high %v1136_v57, %v1140_v58  ;;  %v1148_v5 = vld [vmem:[#allocation6 + $0x5e8] sm:$0xff] }
 0x153   :  { %2612 = vmatprep.mubr.bf16.mxu0 %v4136_v31  ;;  %2698 = vmatprep.mubr.bf16.mxu1 %v4136_v31  ;;  %v3577_v46 = vcombine.high %v1119_v10, %v1123_v11  ;;  %v3576_v53 = vcombine.low %v1119_v10, %v1123_v11  ;;  %v3592_v4 = vcombine.low %v1135_v56, %v1139_v48  ;;  %v1151_v19 = vld [vmem:[#allocation6 + $0x600] sm:$0xff]  ;;  %v1152_v16 = vld [vmem:[#allocation6 + $0x608] sm:$0xff] }
 0x154   :  { %v3594_v1 = vcombine.low %v1136_v57, %v1140_v58  ;;  %v3601_v14 = vcombine.high %v1143_v0, %v1147_v61  ;;  %v3603_v3 = vcombine.high %v1144_v2, %v1148_v5  ;;  %v1155_v15 = vld [vmem:[#allocation6 + $0x620] sm:$0xff]  ;;  %v1156_v17 = vld [vmem:[#allocation6 + $0x628] sm:$0xff]  ;;  %v3600_v25 = vcombine.low %v1143_v0, %v1147_v61 }
 0x155   :  { %2583 = vmatpush1.bf16.msra.mxu0 %v3552_v34  ;;  %2669 = vmatpush1.bf16.msra.mxu1 %v3554_v35  ;;  %v3602_v18 = vcombine.low %v1144_v2, %v1148_v5  ;;  %v3609_v20 = vcombine.high %v1151_v19, %v1155_v15  ;;  %v3611_v22 = vcombine.high %v1152_v16, %v1156_v17  ;;  %v1159_v34 = vld [vmem:[#allocation6 + $0x640] sm:$0xff] }
 0x156   :  { %2584 = vmatprep.subr.bf16.mxu0 %v3561_v23  ;;  %2670 = vmatprep.subr.bf16.mxu1 %v3563_v29  ;;  %v1163_v35 = vld [vmem:[#allocation6 + $0x660] sm:$0xff]  ;;  %v1160_v23 = vld [vmem:[#allocation6 + $0x648] sm:$0xff]  ;;  %v3608_v32 = vcombine.low %v1151_v19, %v1155_v15  ;;  %v3610_v38 = vcombine.low %v1152_v16, %v1156_v17 }
 0x157   :  { %v1164_v29 = vld [vmem:[#allocation6 + $0x668] sm:$0xff]  ;;  %v3617_v39 = vcombine.high %v1159_v34, %v1163_v35  ;;  %v3616_v10 = vcombine.low %v1159_v34, %v1163_v35 }
 0x158   :  { %v3619_v41 = vcombine.high %v1160_v23, %v1164_v29  ;;  %v3618_v11 = vcombine.low %v1160_v23, %v1164_v29 }
 0x159   :  { %2585 = vmatpush1.bf16.msra.mxu0 %v3560_v6  ;;  %2671 = vmatpush1.bf16.msra.mxu1 %v3562_v7  ;;  %v1167_v6 = vld [vmem:[#allocation6 + $0x680] sm:$0xff] }
 0x15a   :  { %2586 = vmatprep.subr.bf16.mxu0 %v3569_v8  ;;  %2672 = vmatprep.subr.bf16.mxu1 %v3571_v9  ;;  %v1171_v7 = vld [vmem:[#allocation6 + $0x6a0] sm:$0xff]  ;;  %v1168_v8 = vld [vmem:[#allocation6 + $0x688] sm:$0xff] }
 0x15b   :  { %v1172_v9 = vld [vmem:[#allocation6 + $0x6a8] sm:$0xff]  ;;  %v3625_v42 = vcombine.high %v1167_v6, %v1171_v7  ;;  %v3624_v49 = vcombine.low %v1167_v6, %v1171_v7 }
 0x15c   :  { %v3627_v43 = vcombine.high %v1168_v8, %v1172_v9  ;;  %v3626_v50 = vcombine.low %v1168_v8, %v1172_v9 }
 0x15d   :  { %2587 = vmatpush1.bf16.msra.mxu0 %v3568_v44  ;;  %2673 = vmatpush1.bf16.msra.mxu1 %v3570_v37  ;;  %v1175_v44 = vld [vmem:[#allocation6 + $0x6c0] sm:$0xff] }
 0x15e   :  { %2588 = vmatprep.subr.bf16.mxu0 %v3577_v46  ;;  %2674 = vmatprep.subr.bf16.mxu1 %v3579_v47  ;;  %v1179_v37 = vld [vmem:[#allocation6 + $0x6e0] sm:$0xff]  ;;  %v1176_v46 = vld [vmem:[#allocation6 + $0x6c8] sm:$0xff] }
 0x15f   :  { %v1180_v47 = vld [vmem:[#allocation6 + $0x6e8] sm:$0xff]  ;;  %v3633_v51 = vcombine.high %v1175_v44, %v1179_v37  ;;  %v3632_v56 = vcombine.low %v1175_v44, %v1179_v37 }
 0x160   :  { %v3635_v52 = vcombine.high %v1176_v46, %v1180_v47  ;;  %v3634_v48 = vcombine.low %v1176_v46, %v1180_v47 }
 0x161   :  { %2589 = vmatpush1.bf16.msra.mxu0 %v3576_v53  ;;  %2675 = vmatpush1.bf16.msra.mxu1 %v3578_v45  ;;  %v1183_v53 = vld [vmem:[#allocation6 + $0x700] sm:$0xff] }
 0x162   :  { %2590 = vmatprep.subr.bf16.mxu0 %v3585_v54  ;;  %2676 = vmatprep.subr.bf16.mxu1 %v3587_v55  ;;  %v1187_v45 = vld [vmem:[#allocation6 + $0x720] sm:$0xff]  ;;  %v1184_v54 = vld [vmem:[#allocation6 + $0x708] sm:$0xff] }
 0x163   :  { %v1188_v55 = vld [vmem:[#allocation6 + $0x728] sm:$0xff]  ;;  %v3641_v57 = vcombine.high %v1183_v53, %v1187_v45  ;;  %v3640_v0 = vcombine.low %v1183_v53, %v1187_v45 }
 0x164   :  { %v3643_v58 = vcombine.high %v1184_v54, %v1188_v55  ;;  %v3642_v61 = vcombine.low %v1184_v54, %v1188_v55 }
 0x165   :  { %2591 = vmatpush1.bf16.msra.mxu0 %v3584_v59  ;;  %2677 = vmatpush1.bf16.msra.mxu1 %v3586_v60  ;;  %v1191_v59 = vld [vmem:[#allocation6 + $0x740] sm:$0xff] }
 0x166   :  { %2592 = vmatprep.subr.bf16.mxu0 %v3593_v62  ;;  %2678 = vmatprep.subr.bf16.mxu1 %v3595_v63  ;;  %v1195_v60 = vld [vmem:[#allocation6 + $0x760] sm:$0xff]  ;;  %v1192_v62 = vld [vmem:[#allocation6 + $0x748] sm:$0xff] }
 0x167   :  { %v1196_v63 = vld [vmem:[#allocation6 + $0x768] sm:$0xff]  ;;  %v3649_v2 = vcombine.high %v1191_v59, %v1195_v60  ;;  %v3648_v19 = vcombine.low %v1191_v59, %v1195_v60 }
 0x168   :  { %v3651_v5 = vcombine.high %v1192_v62, %v1196_v63  ;;  %v3650_v15 = vcombine.low %v1192_v62, %v1196_v63 }
 0x169   :  { %2593 = vmatpush1.bf16.msra.mxu0 %v3592_v4  ;;  %2679 = vmatpush1.bf16.msra.mxu1 %v3594_v1  ;;  %v1199_v4 = vld [vmem:[#allocation6 + $0x780] sm:$0xff] }
 0x16a   :  { %2594 = vmatprep.subr.bf16.mxu0 %v3601_v14  ;;  %2680 = vmatprep.subr.bf16.mxu1 %v3603_v3  ;;  %v1203_v1 = vld [vmem:[#allocation6 + $0x7a0] sm:$0xff]  ;;  %v1200_v14 = vld [vmem:[#allocation6 + $0x788] sm:$0xff] }
 0x16b   :  { %v1204_v3 = vld [vmem:[#allocation6 + $0x7a8] sm:$0xff]  ;;  %v3657_v16 = vcombine.high %v1199_v4, %v1203_v1  ;;  %v3656_v34 = vcombine.low %v1199_v4, %v1203_v1 }
 0x16c   :  { %v3659_v17 = vcombine.high %v1200_v14, %v1204_v3  ;;  %v3658_v35 = vcombine.low %v1200_v14, %v1204_v3  ;;  %v1001_v3 = vld [vmem:[#allocation6 + $0x150] sm:$0xff] }
 0x16d   :  { %2595 = vmatpush1.bf16.msra.mxu0 %v3600_v25  ;;  %2681 = vmatpush1.bf16.msra.mxu1 %v3602_v18  ;;  %v1207_v25 = vld [vmem:[#allocation6 + $0x7c0] sm:$0xff] }
 0x16e   :  { %2596 = vmatprep.subr.bf16.mxu0 %v3609_v20  ;;  %2682 = vmatprep.subr.bf16.mxu1 %v3611_v22  ;;  %v1211_v18 = vld [vmem:[#allocation6 + $0x7e0] sm:$0xff]  ;;  %v1208_v20 = vld [vmem:[#allocation6 + $0x7c8] sm:$0xff] }
 0x16f   :  { %v1212_v22 = vld [vmem:[#allocation6 + $0x7e8] sm:$0xff]  ;;  %v3665_v23 = vcombine.high %v1207_v25, %v1211_v18  ;;  %v3664_v6 = vcombine.low %v1207_v25, %v1211_v18 }
 0x170   :  { %v3667_v29 = vcombine.high %v1208_v20, %v1212_v22  ;;  %v3666_v7 = vcombine.low %v1208_v20, %v1212_v22  ;;  %v1009_v22 = vld [vmem:[#allocation6 + $0x190] sm:$0xff] }
 0x171   :  { %2597 = vmatpush1.bf16.msra.mxu0 %v3608_v32  ;;  %2683 = vmatpush1.bf16.msra.mxu1 %v3610_v38  ;;  %v961_v32 = vld [vmem:[#allocation6 + $0x10] sm:$0xff] }
 0x172   :  { %2598 = vmatprep.subr.bf16.mxu0 %v3617_v39  ;;  %2684 = vmatprep.subr.bf16.mxu1 %v3619_v41  ;;  %v965_v38 = vld [vmem:[#allocation6 + $0x30] sm:$0xff]  ;;  %v962_v39 = vld [vmem:[#allocation6 + $0x18] sm:$0xff] }
 0x173   :  { %v966_v41 = vld [vmem:[#allocation6 + $0x38] sm:$0xff]  ;;  %v3421_v8 = vcombine.high %v961_v32, %v965_v38  ;;  %v3420_v44 = vcombine.low %v961_v32, %v965_v38 }
 0x174   :  { %v3423_v9 = vcombine.high %v962_v39, %v966_v41  ;;  %v3422_v37 = vcombine.low %v962_v39, %v966_v41  ;;  %v1017_v41 = vld [vmem:[#allocation6 + $0x1d0] sm:$0xff] }
 0x175   :  { %2599 = vmatpush1.bf16.msra.mxu0 %v3616_v10  ;;  %2685 = vmatpush1.bf16.msra.mxu1 %v3618_v11  ;;  %v969_v10 = vld [vmem:[#allocation6 + $0x50] sm:$0xff] }
 0x176   :  { %2600 = vmatprep.subr.bf16.mxu0 %v3625_v42  ;;  %2686 = vmatprep.subr.bf16.mxu1 %v3627_v43  ;;  %v973_v11 = vld [vmem:[#allocation6 + $0x70] sm:$0xff]  ;;  %v970_v42 = vld [vmem:[#allocation6 + $0x58] sm:$0xff] }
 0x177   :  { %v974_v43 = vld [vmem:[#allocation6 + $0x78] sm:$0xff]  ;;  %v3429_v46 = vcombine.high %v969_v10, %v973_v11  ;;  %v3428_v53 = vcombine.low %v969_v10, %v973_v11 }
 0x178   :  { %v3431_v47 = vcombine.high %v970_v42, %v974_v43  ;;  %v3430_v45 = vcombine.low %v970_v42, %v974_v43  ;;  %v1025_v43 = vld [vmem:[#allocation6 + $0x210] sm:$0xff] }
 0x179   :  { %2601 = vmatpush1.bf16.msra.mxu0 %v3624_v49  ;;  %2687 = vmatpush1.bf16.msra.mxu1 %v3626_v50  ;;  %v977_v49 = vld [vmem:[#allocation6 + $0x90] sm:$0xff] }
 0x17a   :  { %2602 = vmatprep.subr.bf16.mxu0 %v3633_v51  ;;  %2688 = vmatprep.subr.bf16.mxu1 %v3635_v52  ;;  %v981_v50 = vld [vmem:[#allocation6 + $0xb0] sm:$0xff]  ;;  %v978_v51 = vld [vmem:[#allocation6 + $0x98] sm:$0xff] }
 0x17b   :  { %v982_v52 = vld [vmem:[#allocation6 + $0xb8] sm:$0xff]  ;;  %v3437_v54 = vcombine.high %v977_v49, %v981_v50  ;;  %v3436_v59 = vcombine.low %v977_v49, %v981_v50 }
 0x17c   :  { %v3439_v55 = vcombine.high %v978_v51, %v982_v52  ;;  %v3438_v60 = vcombine.low %v978_v51, %v982_v52  ;;  %v1033_v52 = vld [vmem:[#allocation6 + $0x250] sm:$0xff] }
 0x17d   :  { %2603 = vmatpush1.bf16.msra.mxu0 %v3632_v56  ;;  %2689 = vmatpush1.bf16.msra.mxu1 %v3634_v48  ;;  %v985_v56 = vld [vmem:[#allocation6 + $0xd0] sm:$0xff] }
 0x17e   :  { %2604 = vmatprep.subr.bf16.mxu0 %v3641_v57  ;;  %2690 = vmatprep.subr.bf16.mxu1 %v3643_v58  ;;  %v989_v48 = vld [vmem:[#allocation6 + $0xf0] sm:$0xff]  ;;  %v986_v57 = vld [vmem:[#allocation6 + $0xd8] sm:$0xff] }
 0x17f   :  { %v990_v58 = vld [vmem:[#allocation6 + $0xf8] sm:$0xff]  ;;  %v3445_v62 = vcombine.high %v985_v56, %v989_v48 }
 0x180   :  { %v3447_v63 = vcombine.high %v986_v57, %v990_v58  ;;  %v3446_v4 = vcombine.low %v986_v57, %v990_v58  ;;  %v1041_v58 = vld [vmem:[#allocation6 + $0x290] sm:$0xff] }
 0x181   :  { %2605 = vmatpush1.bf16.msra.mxu0 %v3640_v0  ;;  %2691 = vmatpush1.bf16.msra.mxu1 %v3642_v61  ;;  %v993_v0 = vld [vmem:[#allocation6 + $0x110] sm:$0xff] }
 0x182   :  { %2606 = vmatprep.subr.bf16.mxu0 %v3649_v2  ;;  %2692 = vmatprep.subr.bf16.mxu1 %v3651_v5  ;;  %v997_v61 = vld [vmem:[#allocation6 + $0x130] sm:$0xff]  ;;  %v998_v2 = vld [vmem:[#allocation6 + $0x138] sm:$0xff]  ;;  %v3444_v5 = vcombine.low %v985_v56, %v989_v48 }
 0x183   :  { %v3453_v1 = vcombine.high %v993_v0, %v997_v61 }
 0x185   :  { %2607 = vmatpush1.bf16.msra.mxu0 %v3648_v19  ;;  %2693 = vmatpush1.bf16.msra.mxu1 %v3650_v15  ;;  %v1005_v19 = vld [vmem:[#allocation6 + $0x170] sm:$0xff]  ;;  %v1002_v15 = vld [vmem:[#allocation6 + $0x158] sm:$0xff] }
 0x186   :  { %2608 = vmatprep.subr.bf16.mxu0 %v3657_v16  ;;  %2694 = vmatprep.subr.bf16.mxu1 %v3659_v17  ;;  %v1006_v16 = vld [vmem:[#allocation6 + $0x178] sm:$0xff]  ;;  %v3452_v17 = vcombine.low %v993_v0, %v997_v61  ;;  %v3461_v18 = vcombine.high %v1001_v3, %v1005_v19 }
 0x187   :  { %v3463_v20 = vcombine.high %v1002_v15, %v1006_v16  ;;  %v3462_v32 = vcombine.low %v1002_v15, %v1006_v16  ;;  %v1057_v16 = vld [vmem:[#allocation6 + $0x310] sm:$0xff] }
 0x189   :  { %2609 = vmatpush1.bf16.msra.mxu0 %v3656_v34  ;;  %2695 = vmatpush1.bf16.msra.mxu1 %v3658_v35  ;;  %v1013_v34 = vld [vmem:[#allocation6 + $0x1b0] sm:$0xff]  ;;  %v1010_v35 = vld [vmem:[#allocation6 + $0x198] sm:$0xff] }
 0x18a   :  { %2610 = vmatprep.subr.bf16.mxu0 %v3665_v23  ;;  %2696 = vmatprep.subr.bf16.mxu1 %v3667_v29  ;;  %v1014_v23 = vld [vmem:[#allocation6 + $0x1b8] sm:$0xff]  ;;  %v3460_v29 = vcombine.low %v1001_v3, %v1005_v19  ;;  %v3469_v38 = vcombine.high %v1009_v22, %v1013_v34 }
 0x18b   :  { %v3471_v39 = vcombine.high %v1010_v35, %v1014_v23  ;;  %v3470_v10 = vcombine.low %v1010_v35, %v1014_v23  ;;  %v1065_v23 = vld [vmem:[#allocation6 + $0x350] sm:$0xff] }
 0x18d   :  { %2611 = vmatpush1.bf16.msra.mxu0 %v3664_v6  ;;  %2697 = vmatpush1.bf16.msra.mxu1 %v3666_v7  ;;  %v1021_v6 = vld [vmem:[#allocation6 + $0x1f0] sm:$0xff]  ;;  %v1018_v7 = vld [vmem:[#allocation6 + $0x1d8] sm:$0xff] }
 0x18e   :  { %2709 = vmatprep.subr.bf16.mxu0 %v3421_v8  ;;  %2795 = vmatprep.subr.bf16.mxu1 %v3423_v9  ;;  %v1022_v8 = vld [vmem:[#allocation6 + $0x1f8] sm:$0xff]  ;;  %v3468_v9 = vcombine.low %v1009_v22, %v1013_v34  ;;  %v3477_v11 = vcombine.high %v1017_v41, %v1021_v6 }
 0x18f   :  { %v3479_v42 = vcombine.high %v1018_v7, %v1022_v8  ;;  %v3478_v49 = vcombine.low %v1018_v7, %v1022_v8  ;;  %v1073_v8 = vld [vmem:[#allocation6 + $0x390] sm:$0xff] }
 0x190   :  { %2613 = vmatmul.mubr.bf16.vlgmr.msra.gmra.mrb[16].mxu0 %v4132_v27  ;;  %2699 = vmatmul.mubr.bf16.vlgmr.msra.gmra.mrb[16].mxu1 %v4132_v27 }
 0x191   :  { %2710 = vmatpush1.bf16.msra.mxu0 %v3420_v44  ;;  %2741 = vmatprep.mubr.bf16.mxu0 %v4126_v12  ;;  %v1029_v44 = vld [vmem:[#allocation6 + $0x230] sm:$0xff] }
 0x192   :  { %2796 = vmatpush1.bf16.msra.mxu1 %v3422_v37  ;;  %2827 = vmatprep.mubr.bf16.mxu1 %v4126_v12  ;;  %v994_v12 = vld [vmem:[#allocation6 + $0x118] sm:$0xff]  ;;  %v3485_v50 = vcombine.high %v1025_v43, %v1029_v44 }
 0x193   :  { %2711 = vmatprep.subr.bf16.mxu0 %v3429_v46  ;;  %2797 = vmatprep.subr.bf16.mxu1 %v3431_v47  ;;  %v3455_v14 = vcombine.high %v994_v12, %v998_v2  ;;  %v3454_v25 = vcombine.low %v994_v12, %v998_v2  ;;  %v1026_v37 = vld [vmem:[#allocation6 + $0x218] sm:$0xff]  ;;  %v3476_v47 = vcombine.low %v1017_v41, %v1021_v6  ;;  %v1049_v2 = vld [vmem:[#allocation6 + $0x2d0] sm:$0xff] }
 0x194   :  { %v1030_v46 = vld [vmem:[#allocation6 + $0x238] sm:$0xff] }
 0x195   :  { %2712 = vmatpush1.bf16.msra.mxu0 %v3428_v53  ;;  %v3487_v51 = vcombine.high %v1026_v37, %v1030_v46  ;;  %v1037_v53 = vld [vmem:[#allocation6 + $0x270] sm:$0xff]  ;;  %v3486_v56 = vcombine.low %v1026_v37, %v1030_v46 }
 0x196   :  { %2798 = vmatpush1.bf16.msra.mxu1 %v3430_v45  ;;  %2713 = vmatprep.subr.bf16.mxu0 %v3437_v54  ;;  %v1034_v45 = vld [vmem:[#allocation6 + $0x258] sm:$0xff]  ;;  %v3493_v48 = vcombine.high %v1033_v52, %v1037_v53  ;;  %v1081_v46 = vld [vmem:[#allocation6 + $0x3d0] sm:$0xff] }
 0x197   :  { %2799 = vmatprep.subr.bf16.mxu1 %v3439_v55  ;;  %v1038_v54 = vld [vmem:[#allocation6 + $0x278] sm:$0xff]  ;;  %v3484_v55 = vcombine.low %v1025_v43, %v1029_v44 }
 0x198   :  { %v3495_v57 = vcombine.high %v1034_v45, %v1038_v54  ;;  %v3494_v0 = vcombine.low %v1034_v45, %v1038_v54  ;;  %v1089_v54 = vld [vmem:[#allocation6 + $0x410] sm:$0xff] }
 0x199   :  { %2714 = vmatpush1.bf16.msra.mxu0 %v3436_v59  ;;  %v1045_v59 = vld [vmem:[#allocation6 + $0x2b0] sm:$0xff] }
 0x19a   :  { %2800 = vmatpush1.bf16.msra.mxu1 %v3438_v60  ;;  %2715 = vmatprep.subr.bf16.mxu0 %v3445_v62  ;;  %v1042_v60 = vld [vmem:[#allocation6 + $0x298] sm:$0xff]  ;;  %v3501_v61 = vcombine.high %v1041_v58, %v1045_v59 }
 0x19b   :  { %2801 = vmatprep.subr.bf16.mxu1 %v3447_v63  ;;  %v1046_v62 = vld [vmem:[#allocation6 + $0x2b8] sm:$0xff]  ;;  %v3492_v63 = vcombine.low %v1033_v52, %v1037_v53 }
 0x19c   :  { %v3503_v12 = vcombine.high %v1042_v60, %v1046_v62  ;;  %v3502_v3 = vcombine.low %v1042_v60, %v1046_v62  ;;  %v1097_v62 = vld [vmem:[#allocation6 + $0x450] sm:$0xff] }
 0x19d   :  { %2716 = vmatpush1.bf16.msra.mxu0 %v3444_v5  ;;  %v1053_v5 = vld [vmem:[#allocation6 + $0x2f0] sm:$0xff] }
 0x19e   :  { %2802 = vmatpush1.bf16.msra.mxu1 %v3446_v4  ;;  %2717 = vmatprep.subr.bf16.mxu0 %v3453_v1  ;;  %v1050_v4 = vld [vmem:[#allocation6 + $0x2d8] sm:$0xff]  ;;  %v3509_v19 = vcombine.high %v1049_v2, %v1053_v5 }
 0x19f   :  { %2803 = vmatprep.subr.bf16.mxu1 %v3455_v14  ;;  %v1054_v1 = vld [vmem:[#allocation6 + $0x2f8] sm:$0xff]  ;;  %v3500_v14 = vcombine.low %v1041_v58, %v1045_v59 }
 0x1a0   :  { %v3511_v15 = vcombine.high %v1050_v4, %v1054_v1  ;;  %v3510_v22 = vcombine.low %v1050_v4, %v1054_v1  ;;  %v1105_v4 = vld [vmem:[#allocation6 + $0x490] sm:$0xff] }
 0x1a1   :  { %2718 = vmatpush1.bf16.msra.mxu0 %v3452_v17  ;;  %v1061_v17 = vld [vmem:[#allocation6 + $0x330] sm:$0xff] }
 0x1a2   :  { %2804 = vmatpush1.bf16.msra.mxu1 %v3454_v25  ;;  %2719 = vmatprep.subr.bf16.mxu0 %v3461_v18  ;;  %v1058_v25 = vld [vmem:[#allocation6 + $0x318] sm:$0xff]  ;;  %v3517_v34 = vcombine.high %v1057_v16, %v1061_v17  ;;  %v1109_v1 = vld [vmem:[#allocation6 + $0x4b0] sm:$0xff] }
 0x1a3   :  { %2805 = vmatprep.subr.bf16.mxu1 %v3463_v20  ;;  %v1062_v18 = vld [vmem:[#allocation6 + $0x338] sm:$0xff]  ;;  %v3508_v20 = vcombine.low %v1049_v2, %v1053_v5 }
 0x1a4   :  { %v3519_v35 = vcombine.high %v1058_v25, %v1062_v18  ;;  %v3518_v41 = vcombine.low %v1058_v25, %v1062_v18  ;;  %v1113_v18 = vld [vmem:[#allocation6 + $0x4d0] sm:$0xff] }
 0x1a5   :  { %2720 = vmatpush1.bf16.msra.mxu0 %v3460_v29  ;;  %v1069_v29 = vld [vmem:[#allocation6 + $0x370] sm:$0xff] }
 0x1a6   :  { %2806 = vmatpush1.bf16.msra.mxu1 %v3462_v32  ;;  %2721 = vmatprep.subr.bf16.mxu0 %v3469_v38  ;;  %v1066_v32 = vld [vmem:[#allocation6 + $0x358] sm:$0xff]  ;;  %v3525_v6 = vcombine.high %v1065_v23, %v1069_v29 }
 0x1a7   :  { %2807 = vmatprep.subr.bf16.mxu1 %v3471_v39  ;;  %v1070_v38 = vld [vmem:[#allocation6 + $0x378] sm:$0xff]  ;;  %v3516_v39 = vcombine.low %v1057_v16, %v1061_v17  ;;  %v3565_v17 = vcombine.high %v1105_v4, %v1109_v1 }
 0x1a8   :  { %v3527_v7 = vcombine.high %v1066_v32, %v1070_v38  ;;  %v3526_v43 = vcombine.low %v1066_v32, %v1070_v38  ;;  %v1121_v32 = vld [vmem:[#allocation6 + $0x510] sm:$0xff] }
 0x1a9   :  { %2722 = vmatpush1.bf16.msra.mxu0 %v3468_v9  ;;  %v1077_v9 = vld [vmem:[#allocation6 + $0x3b0] sm:$0xff] }
 0x1aa   :  { %2808 = vmatpush1.bf16.msra.mxu1 %v3470_v10  ;;  %2723 = vmatprep.subr.bf16.mxu0 %v3477_v11  ;;  %v1074_v10 = vld [vmem:[#allocation6 + $0x398] sm:$0xff]  ;;  %v3533_v44 = vcombine.high %v1073_v8, %v1077_v9  ;;  %v1125_v38 = vld [vmem:[#allocation6 + $0x530] sm:$0xff] }
 0x1ab   :  { %2809 = vmatprep.subr.bf16.mxu1 %v3479_v42  ;;  %v1078_v11 = vld [vmem:[#allocation6 + $0x3b8] sm:$0xff]  ;;  %v3524_v42 = vcombine.low %v1065_v23, %v1069_v29 }
 0x1ac   :  { %v3535_v37 = vcombine.high %v1074_v10, %v1078_v11  ;;  %v3534_v52 = vcombine.low %v1074_v10, %v1078_v11  ;;  %v1133_v10 = vld [vmem:[#allocation6 + $0x570] sm:$0xff]  ;;  %v1130_v11 = vld [vmem:[#allocation6 + $0x558] sm:$0xff] }
 0x1ad   :  { %2724 = vmatpush1.bf16.msra.mxu0 %v3476_v47  ;;  %v1085_v47 = vld [vmem:[#allocation6 + $0x3f0] sm:$0xff] }
 0x1ae   :  { %2810 = vmatpush1.bf16.msra.mxu1 %v3478_v49  ;;  %2725 = vmatprep.subr.bf16.mxu0 %v3485_v50  ;;  %v1082_v49 = vld [vmem:[#allocation6 + $0x3d8] sm:$0xff]  ;;  %v3541_v53 = vcombine.high %v1081_v46, %v1085_v47 }
 0x1af   :  { %2811 = vmatprep.subr.bf16.mxu1 %v3487_v51  ;;  %v1086_v50 = vld [vmem:[#allocation6 + $0x3f8] sm:$0xff]  ;;  %v3532_v51 = vcombine.low %v1073_v8, %v1077_v9  ;;  %v1129_v9 = vld [vmem:[#allocation6 + $0x550] sm:$0xff] }
 0x1b0   :  { %v3543_v45 = vcombine.high %v1082_v49, %v1086_v50  ;;  %v3542_v58 = vcombine.low %v1082_v49, %v1086_v50  ;;  %v1141_v49 = vld [vmem:[#allocation6 + $0x5b0] sm:$0xff]  ;;  %v1138_v50 = vld [vmem:[#allocation6 + $0x598] sm:$0xff] }
 0x1b1   :  { %2726 = vmatpush1.bf16.msra.mxu0 %v3484_v55  ;;  %v1093_v55 = vld [vmem:[#allocation6 + $0x430] sm:$0xff] }
 0x1b2   :  { %2812 = vmatpush1.bf16.msra.mxu1 %v3486_v56  ;;  %2727 = vmatprep.subr.bf16.mxu0 %v3493_v48  ;;  %v1090_v56 = vld [vmem:[#allocation6 + $0x418] sm:$0xff]  ;;  %v3549_v59 = vcombine.high %v1089_v54, %v1093_v55 }
 0x1b3   :  { %2813 = vmatprep.subr.bf16.mxu1 %v3495_v57  ;;  %v1094_v48 = vld [vmem:[#allocation6 + $0x438] sm:$0xff]  ;;  %v3540_v57 = vcombine.low %v1081_v46, %v1085_v47  ;;  %v1137_v47 = vld [vmem:[#allocation6 + $0x590] sm:$0xff] }
 0x1b4   :  { %v3551_v60 = vcombine.high %v1090_v56, %v1094_v48  ;;  %v3550_v2 = vcombine.low %v1090_v56, %v1094_v48  ;;  %v1149_v56 = vld [vmem:[#allocation6 + $0x5f0] sm:$0xff]  ;;  %v1146_v48 = vld [vmem:[#allocation6 + $0x5d8] sm:$0xff] }
 0x1b5   :  { %2728 = vmatpush1.bf16.msra.mxu0 %v3492_v63  ;;  %v1101_v63 = vld [vmem:[#allocation6 + $0x470] sm:$0xff] }
 0x1b6   :  { %2814 = vmatpush1.bf16.msra.mxu1 %v3494_v0  ;;  %2729 = vmatprep.subr.bf16.mxu0 %v3501_v61  ;;  %v3548_v0 = vcombine.low %v1089_v54, %v1093_v55  ;;  %v1098_v61 = vld [vmem:[#allocation6 + $0x458] sm:$0xff]  ;;  %v3557_v5 = vcombine.high %v1097_v62, %v1101_v63  ;;  %v1145_v55 = vld [vmem:[#allocation6 + $0x5d0] sm:$0xff] }
 0x1b7   :  { %2815 = vmatprep.subr.bf16.mxu1 %v3503_v12  ;;  %v1102_v12 = vld [vmem:[#allocation6 + $0x478] sm:$0xff] }
 0x1b8   :  { %v3558_v16 = vcombine.low %v1098_v61, %v1102_v12 }
 0x1b9   :  { %2730 = vmatpush1.bf16.msra.mxu0 %v3500_v14  ;;  %v3559_v14 = vcombine.high %v1098_v61, %v1102_v12  ;;  %v1154_v61 = vld [vmem:[#allocation6 + $0x618] sm:$0xff] }
 0x1ba   :  { %2816 = vmatpush1.bf16.msra.mxu1 %v3502_v3  ;;  %2731 = vmatprep.subr.bf16.mxu0 %v3509_v19  ;;  %v1106_v3 = vld [vmem:[#allocation6 + $0x498] sm:$0xff] }
 0x1bb   :  { %2817 = vmatprep.subr.bf16.mxu1 %v3511_v15  ;;  %v1110_v19 = vld [vmem:[#allocation6 + $0x4b8] sm:$0xff]  ;;  %v3556_v15 = vcombine.low %v1097_v62, %v1101_v63  ;;  %v1153_v63 = vld [vmem:[#allocation6 + $0x610] sm:$0xff] }
 0x1bc   :  { %v3567_v25 = vcombine.high %v1106_v3, %v1110_v19  ;;  %v1158_v12 = vld [vmem:[#allocation6 + $0x638] sm:$0xff] }
 0x1bd   :  { %2732 = vmatpush1.bf16.msra.mxu0 %v3508_v20  ;;  %v1117_v20 = vld [vmem:[#allocation6 + $0x4f0] sm:$0xff] }
 0x1be   :  { %2818 = vmatpush1.bf16.msra.mxu1 %v3510_v22  ;;  %2733 = vmatprep.subr.bf16.mxu0 %v3517_v34  ;;  %v1114_v22 = vld [vmem:[#allocation6 + $0x4d8] sm:$0xff]  ;;  %v3573_v23 = vcombine.high %v1113_v18, %v1117_v20 }
 0x1bf   :  { %2819 = vmatprep.subr.bf16.mxu1 %v3519_v35  ;;  %v1118_v34 = vld [vmem:[#allocation6 + $0x4f8] sm:$0xff]  ;;  %v3564_v35 = vcombine.low %v1105_v4, %v1109_v1  ;;  %v3615_v1 = vcombine.high %v1154_v61, %v1158_v12 }
 0x1c0   :  { %v3575_v29 = vcombine.high %v1114_v22, %v1118_v34 }
 0x1c1   :  { %2734 = vmatpush1.bf16.msra.mxu0 %v3516_v39  ;;  %v1122_v39 = vld [vmem:[#allocation6 + $0x518] sm:$0xff] }
 0x1c2   :  { %2820 = vmatpush1.bf16.msra.mxu1 %v3518_v41  ;;  %2735 = vmatprep.subr.bf16.mxu0 %v3525_v6  ;;  %v1126_v41 = vld [vmem:[#allocation6 + $0x538] sm:$0xff]  ;;  %v3574_v6 = vcombine.low %v1114_v22, %v1118_v34  ;;  %v1173_v22 = vld [vmem:[#allocation6 + $0x6b0] sm:$0xff] }
 0x1c3   :  { %2821 = vmatprep.subr.bf16.mxu1 %v3527_v7  ;;  %v3581_v7 = vcombine.high %v1121_v32, %v1125_v38  ;;  %v3583_v8 = vcombine.high %v1122_v39, %v1126_v41  ;;  %v1170_v34 = vld [vmem:[#allocation6 + $0x698] sm:$0xff] }
 0x1c5   :  { %2736 = vmatpush1.bf16.msra.mxu0 %v3524_v42  ;;  %v1134_v42 = vld [vmem:[#allocation6 + $0x578] sm:$0xff] }
 0x1c6   :  { %2822 = vmatpush1.bf16.msra.mxu1 %v3526_v43  ;;  %2737 = vmatprep.subr.bf16.mxu0 %v3533_v44  ;;  %v3580_v43 = vcombine.low %v1121_v32, %v1125_v38  ;;  %v3582_v44 = vcombine.low %v1122_v39, %v1126_v41  ;;  %v3591_v46 = vcombine.high %v1130_v11, %v1134_v42  ;;  %v1177_v38 = vld [vmem:[#allocation6 + $0x6d0] sm:$0xff]  ;;  %v1178_v41 = vld [vmem:[#allocation6 + $0x6d8] sm:$0xff] }
 0x1c7   :  { %2823 = vmatprep.subr.bf16.mxu1 %v3535_v37  ;;  %v3589_v37 = vcombine.high %v1129_v9, %v1133_v10  ;;  %v1181_v39 = vld [vmem:[#allocation6 + $0x6f0] sm:$0xff] }
 0x1c9   :  { %2738 = vmatpush1.bf16.msra.mxu0 %v3532_v51  ;;  %v1142_v51 = vld [vmem:[#allocation6 + $0x5b8] sm:$0xff] }
 0x1ca   :  { %2824 = vmatpush1.bf16.msra.mxu1 %v3534_v52  ;;  %2739 = vmatprep.subr.bf16.mxu0 %v3541_v53  ;;  %v3588_v52 = vcombine.low %v1129_v9, %v1133_v10  ;;  %v3590_v53 = vcombine.low %v1130_v11, %v1134_v42  ;;  %v3599_v54 = vcombine.high %v1138_v50, %v1142_v51  ;;  %v1185_v10 = vld [vmem:[#allocation6 + $0x710] sm:$0xff]  ;;  %v1186_v42 = vld [vmem:[#allocation6 + $0x718] sm:$0xff] }
 0x1cb   :  { %2825 = vmatprep.subr.bf16.mxu1 %v3543_v45  ;;  %v3597_v45 = vcombine.high %v1137_v47, %v1141_v49  ;;  %v1189_v11 = vld [vmem:[#allocation6 + $0x730] sm:$0xff] }
 0x1cd   :  { %2740 = vmatpush1.bf16.msra.mxu0 %v3540_v57  ;;  %v1150_v57 = vld [vmem:[#allocation6 + $0x5f8] sm:$0xff] }
 0x1ce   :  { %2826 = vmatpush1.bf16.msra.mxu1 %v3542_v58  ;;  %2752 = vmatprep.subr.bf16.mxu0 %v3549_v59  ;;  %v3596_v58 = vcombine.low %v1137_v47, %v1141_v49  ;;  %v3598_v59 = vcombine.low %v1138_v50, %v1142_v51  ;;  %v3607_v62 = vcombine.high %v1146_v48, %v1150_v57  ;;  %v1193_v49 = vld [vmem:[#allocation6 + $0x750] sm:$0xff]  ;;  %v1194_v51 = vld [vmem:[#allocation6 + $0x758] sm:$0xff] }
 0x1cf   :  { %2838 = vmatprep.subr.bf16.mxu1 %v3551_v60  ;;  %v3605_v60 = vcombine.high %v1145_v55, %v1149_v56  ;;  %v1197_v50 = vld [vmem:[#allocation6 + $0x770] sm:$0xff] }
 0x1d0   :  { %2742 = vmatmul.mubr.bf16.vlgmr.msra.gmra.mrb[20].mxu0 %v4123_v13 }
 0x1d1   :  { %2828 = vmatmul.mubr.bf16.vlgmr.msra.gmra.mrb[20].mxu1 %v4123_v13  ;;  %2753 = vmatpush1.bf16.msra.mxu0 %v3548_v0  ;;  %v3566_v13 = vcombine.low %v1106_v3, %v1110_v19  ;;  %v1157_v0 = vld [vmem:[#allocation6 + $0x630] sm:$0xff]  ;;  %v1162_v19 = vld [vmem:[#allocation6 + $0x658] sm:$0xff] }
 0x1d2   :  { %2784 = vmatprep.mubr.bf16.mxu0 %v4136_v31  ;;  %2839 = vmatpush1.bf16.msra.mxu1 %v3550_v2  ;;  %v3604_v2 = vcombine.low %v1145_v55, %v1149_v56  ;;  %v3613_v4 = vcombine.high %v1153_v63, %v1157_v0  ;;  %v1165_v3 = vld [vmem:[#allocation6 + $0x670] sm:$0xff] }
 0x1d3   :  { %2870 = vmatprep.mubr.bf16.mxu1 %v4136_v31  ;;  %2754 = vmatprep.subr.bf16.mxu0 %v3557_v5  ;;  %v3572_v31 = vcombine.low %v1113_v18, %v1117_v20  ;;  %v3606_v5 = vcombine.low %v1146_v48, %v1150_v57  ;;  %v1169_v20 = vld [vmem:[#allocation6 + $0x690] sm:$0xff]  ;;  %v1202_v57 = vld [vmem:[#allocation6 + $0x798] sm:$0xff] }
 0x1d4   :  { %2840 = vmatprep.subr.bf16.mxu1 %v3559_v14  ;;  %v1161_v14 = vld [vmem:[#allocation6 + $0x650] sm:$0xff] }
 0x1d5   :  { %2755 = vmatpush1.bf16.msra.mxu0 %v3556_v15  ;;  %v1166_v15 = vld [vmem:[#allocation6 + $0x678] sm:$0xff]  ;;  %v1201_v56 = vld [vmem:[#allocation6 + $0x790] sm:$0xff] }
 0x1d6   :  { %2841 = vmatpush1.bf16.msra.mxu1 %v3558_v16  ;;  %2756 = vmatprep.subr.bf16.mxu0 %v3565_v17  ;;  %v3612_v16 = vcombine.low %v1153_v63, %v1157_v0  ;;  %v3614_v17 = vcombine.low %v1154_v61, %v1158_v12  ;;  %v3623_v18 = vcombine.high %v1162_v19, %v1166_v15  ;;  %v1205_v48 = vld [vmem:[#allocation6 + $0x7b0] sm:$0xff]  ;;  %v1210_v12 = vld [vmem:[#allocation6 + $0x7d8] sm:$0xff] }
 0x1d7   :  { %2842 = vmatprep.subr.bf16.mxu1 %v3567_v25  ;;  %v3621_v25 = vcombine.high %v1161_v14, %v1165_v3  ;;  %v1209_v0 = vld [vmem:[#allocation6 + $0x7d0] sm:$0xff] }
 0x1d8   :  { %v1213_v61 = vld [vmem:[#allocation6 + $0x7f0] sm:$0xff] }
 0x1d9   :  { %2757 = vmatpush1.bf16.msra.mxu0 %v3564_v35  ;;  %v1174_v35 = vld [vmem:[#allocation6 + $0x6b8] sm:$0xff] }
 0x1da   :  { %2843 = vmatpush1.bf16.msra.mxu1 %v3566_v13  ;;  %2758 = vmatprep.subr.bf16.mxu0 %v3573_v23  ;;  %v3620_v13 = vcombine.low %v1161_v14, %v1165_v3  ;;  %v3622_v23 = vcombine.low %v1162_v19, %v1166_v15  ;;  %v3631_v32 = vcombine.high %v1170_v34, %v1174_v35  ;;  %v3813_v15 = vld [vmem:[%s4313_s6 + $0x40] sm:$0xff]  }
 0x1db   :  { %2844 = vmatprep.subr.bf16.mxu1 %v3575_v29  ;;  %v3629_v29 = vcombine.high %v1169_v20, %v1173_v22  ;;  %v3668_v3 = vcombine.low %v1209_v0, %v1213_v61 }
 0x1dd   :  { %2759 = vmatpush1.bf16.msra.mxu0 %v3572_v31  ;;  %v1182_v31 = vld [vmem:[#allocation6 + $0x6f8] sm:$0xff] }
 0x1de   :  { %2845 = vmatpush1.bf16.msra.mxu1 %v3574_v6  ;;  %2760 = vmatprep.subr.bf16.mxu0 %v3581_v7  ;;  %v3628_v6 = vcombine.low %v1169_v20, %v1173_v22  ;;  %v3630_v7 = vcombine.low %v1170_v34, %v1174_v35  ;;  %v3639_v9 = vcombine.high %v1178_v41, %v1182_v31  ;;  %v3818_v20 = vld [vmem:[%s4313_s6 + $0x10] sm:$0xff]   ;;  %v3820_v22 = vld [vmem:[%s4313_s6 + $0x18] sm:$0xff]   ;;  %v3821_v34 = vld [vmem:[%s4313_s6 + $0x60] sm:$0xff]  }
 0x1df   :  { %2846 = vmatprep.subr.bf16.mxu1 %v3583_v8  ;;  %v3637_v8 = vcombine.high %v1177_v38, %v1181_v39  ;;  %v4186_v35 = vld [vmem:[%s4312_s5] sm:$0xff] }
 0x1e1   :  { %2761 = vmatpush1.bf16.msra.mxu0 %v3580_v43  ;;  %v1190_v43 = vld [vmem:[#allocation6 + $0x738] sm:$0xff] }
 0x1e2   :  { %2847 = vmatpush1.bf16.msra.mxu1 %v3582_v44  ;;  %2762 = vmatprep.subr.bf16.mxu0 %v3589_v37  ;;  %v3636_v44 = vcombine.low %v1177_v38, %v1181_v39  ;;  %v3638_v37 = vcombine.low %v1178_v41, %v1182_v31  ;;  %v3647_v47 = vcombine.high %v1186_v42, %v1190_v43  ;;  %v3822_v41 = vld [vmem:[%s4313_s6 + $0x20] sm:$0xff]  }
 0x1e3   :  { %2848 = vmatprep.subr.bf16.mxu1 %v3591_v46  ;;  %v3645_v46 = vcombine.high %v1185_v10, %v1189_v11 }
 0x1e5   :  { %2763 = vmatpush1.bf16.msra.mxu0 %v3588_v52  ;;  %v1198_v52 = vld [vmem:[#allocation6 + $0x778] sm:$0xff] }
 0x1e6   :  { %2849 = vmatpush1.bf16.msra.mxu1 %v3590_v53  ;;  %2764 = vmatprep.subr.bf16.mxu0 %v3597_v45  ;;  %v3644_v53 = vcombine.low %v1185_v10, %v1189_v11  ;;  %v3646_v45 = vcombine.low %v1186_v42, %v1190_v43  ;;  %v3655_v55 = vcombine.high %v1194_v51, %v1198_v52 }
 0x1e7   :  { %2850 = vmatprep.subr.bf16.mxu1 %v3599_v54  ;;  %v3653_v54 = vcombine.high %v1193_v49, %v1197_v50 }
 0x1e9   :  { %2765 = vmatpush1.bf16.msra.mxu0 %v3596_v58  ;;  %v1206_v58 = vld [vmem:[#allocation6 + $0x7b8] sm:$0xff] }
 0x1ea   :  { %2851 = vmatpush1.bf16.msra.mxu1 %v3598_v59  ;;  %2766 = vmatprep.subr.bf16.mxu0 %v3605_v60  ;;  %v3652_v59 = vcombine.low %v1193_v49, %v1197_v50  ;;  %v3654_v60 = vcombine.low %v1194_v51, %v1198_v52  ;;  %v3663_v63 = vcombine.high %v1202_v57, %v1206_v58  ;;  %v3824_v52 = vld [vmem:[%s4313_s6 + $0x28] sm:$0xff]  }
 0x1eb   :  { %2852 = vmatprep.subr.bf16.mxu1 %v3607_v62  ;;  %v3661_v62 = vcombine.high %v1201_v56, %v1205_v48 }
 0x1ed   :  { %2767 = vmatpush1.bf16.msra.mxu0 %v3604_v2  ;;  %v1214_v2 = vld [vmem:[#allocation6 + $0x7f8] sm:$0xff] }
 0x1ee   :  { %2853 = vmatpush1.bf16.msra.mxu1 %v3606_v5  ;;  %2768 = vmatprep.subr.bf16.mxu0 %v3613_v4  ;;  %v3660_v5 = vcombine.low %v1201_v56, %v1205_v48  ;;  %v3662_v4 = vcombine.low %v1202_v57, %v1206_v58  ;;  %v3671_v14 = vcombine.high %v1210_v12, %v1214_v2  ;;  %v3825_v58 = vld [vmem:[%s4313_s6 + $0x70] sm:$0xff]  }
 0x1ef   :  { %2854 = vmatprep.subr.bf16.mxu1 %v3615_v1  ;;  %v3669_v1 = vcombine.high %v1209_v0, %v1213_v61  ;;  %v3670_v19 = vcombine.low %v1210_v12, %v1214_v2  ;;  %v2945_v0 = vld [vmem:[%s4314_s7] sm:$0x7]  ;;  %v3827_v12 = vld [vmem:[%s4313_s6 + $0x78] sm:$0xff]  }
 0x1f1   :  { %2769 = vmatpush1.bf16.msra.mxu0 %v3612_v16  ;;  %v3814_v16 = vld [vmem:[%s4313_s6] sm:$0xff]  }
 0x1f2   :  { %2855 = vmatpush1.bf16.msra.mxu1 %v3614_v17  ;;  %2770 = vmatprep.subr.bf16.mxu0 %v3621_v25  ;;  %v3815_v17 = vld [vmem:[%s4313_s6 + $0x48] sm:$0xff]  }
 0x1f3   :  { %2856 = vmatprep.subr.bf16.mxu1 %v3623_v18  ;;  %v3816_v25 = vld [vmem:[%s4313_s6 + $0x8] sm:$0xff]   ;;  %v3817_v18 = vld [vmem:[%s4313_s6 + $0x50] sm:$0xff]  }
 0x1f5   :  { %2771 = vmatpush1.bf16.msra.mxu0 %v3620_v13  ;;  %v1220_v13 = vrot.slane %v4186_v35, %v4064_v21 }
 0x1f6   :  { %2857 = vmatpush1.bf16.msra.mxu1 %v3622_v23  ;;  %2772 = vmatprep.subr.bf16.mxu0 %v3629_v29  ;;  %v1228_v23 = vrot.slane %v4186_v35, %v4071_v26  ;;  %v1224_v29 = vrot.slane %v4186_v35, %v4069_v24 }
 0x1f7   :  { %2858 = vmatprep.subr.bf16.mxu1 %v3631_v32  ;;  %v1232_v32 = vrot.slane %v4186_v35, %v4073_v40 }
 0x1f9   :  { %2773 = vmatpush1.bf16.msra.mxu0 %v3628_v6 }
 0x1fa   :  { %2859 = vmatpush1.bf16.msra.mxu1 %v3630_v7  ;;  %2774 = vmatprep.subr.bf16.mxu0 %v3637_v8 }
 0x1fb   :  { %2860 = vmatprep.subr.bf16.mxu1 %v3639_v9 }
 0x1fd   :  { %2775 = vmatpush1.bf16.msra.mxu0 %v3636_v44 }
 0x1fe   :  { %2861 = vmatpush1.bf16.msra.mxu1 %v3638_v37  ;;  %2776 = vmatprep.subr.bf16.mxu0 %v3645_v46  ;;  %v3823_v46 = vld [vmem:[%s4313_s6 + $0x68] sm:$0xff]  }
 0x1ff   :  { %2862 = vmatprep.subr.bf16.mxu1 %v3647_v47 }
 0x201   :  { %2777 = vmatpush1.bf16.msra.mxu0 %v3644_v53 }
 0x202   :  { %2863 = vmatpush1.bf16.msra.mxu1 %v3646_v45  ;;  %2778 = vmatprep.subr.bf16.mxu0 %v3653_v54 }
 0x203   :  { %2864 = vmatprep.subr.bf16.mxu1 %v3655_v55 }
 0x205   :  { %2779 = vmatpush1.bf16.msra.mxu0 %v3652_v59 }
 0x206   :  { %2865 = vmatpush1.bf16.msra.mxu1 %v3654_v60  ;;  %2780 = vmatprep.subr.bf16.mxu0 %v3661_v62  ;;  %v3826_v60 = vld [vmem:[%s4313_s6 + $0x30] sm:$0xff]   ;;  %v3917_v62 = vmov 65535  }
 0x207   :  { %2866 = vmatprep.subr.bf16.mxu1 %v3663_v63  ;;  %v2957_v63 = vsel %vm2955_vm1, 4294967295, %v3917_v62  ;;  %v3690_v62 = vld [vmem:[%s4315_s8] ss:$0 sm:$0xff] }
 0x208   :  { %v2958_v61 = vsel %vm2956_vm2, %v2957_v63, 0 }
 0x209   :  { %2781 = vmatpush1.bf16.msra.mxu0 %v3660_v5  ;;  %v2960_v2 = vand.u32 %v2958_v61, %v2945_v0  ;;  %v3828_v5 = vld [vmem:[%s4313_s6 + $0x38] sm:$0xff]  }
 0x20a   :  { %2867 = vmatpush1.bf16.msra.mxu1 %v3662_v4  ;;  %2782 = vmatprep.subr.bf16.mxu0 %v3669_v1  ;;  %v3918_v4 = vmov 0.0   ;;  %v3829_v1 = vld [vmem:[%s4308_s1] sm:$0xff]  }
 0x20b   :  { %2868 = vmatprep.subr.bf16.mxu1 %v3671_v14  ;;  %v3830_v14 = vld [vmem:[%s4316_s9] sm:$0xff]  }
 0x20d   :  { %2783 = vmatpush1.bf16.msra.mxu0 %v3668_v3  ;;  %v3831_v3 = vld [vmem:[%s4316_s9 + $0x8] sm:$0xff]  }
 0x20e   :  { %2869 = vmatpush1.bf16.msra.mxu1 %v3670_v19  ;;  %3736 = vmatprep.subr.bf16.mxu0 %v3918_v4  ;;  %v3832_v19 = vld [vmem:[%s4316_s9 + $0x10] sm:$0xff]  }
 0x20f   :  { %3703 = vmatprep.subr.bf16.mxu1 %v3813_v15  ;;  %v3833_v15 = vld [vmem:[%s4316_s9 + $0x18] sm:$0xff]  }
 0x210   :  { %2785 = vmatmul.mubr.bf16.vlgmr.msra.gmra.mrb[20].mxu0 %v4132_v27 }
 0x211   :  { %2871 = vmatmul.mubr.bf16.vlgmr.msra.gmra.mrb[20].mxu1 %v4132_v27  ;;  %v3819_v27 = vld [vmem:[%s4313_s6 + $0x58] sm:$0xff]   ;;  %3737 = vmatpush3.bf16.msra.mxu0 %v2960_v2 }
 0x212   :  { %3704 = vmatpush3.bf16.msra.mxu1 %v3814_v16  ;;  %3738 = vmatprep.mubr.msk.bf16.mxu0 %vm3919_vm3, %v3918_v4  ;;  %v3834_v16 = vld [vmem:[%s4316_s9 + $0x20] sm:$0xff]  }
 0x213   :  { %3705 = vmatprep.subr.bf16.mxu1 %v3815_v17  ;;  %3742 = vmatprep.subr.bf16.mxu0 %v3918_v4  ;;  %v1236_v17 = vrot.slane %v4186_v35, %v4076_v28 }
 0x216   :  { %3706 = vmatpush3.bf16.msra.mxu1 %v3816_v25  ;;  %v1244_v25 = vrot.slane %v4186_v35, %v4083_v33 }
 0x217   :  { %3707 = vmatprep.subr.bf16.mxu1 %v3817_v18  ;;  %v1240_v18 = vrot.slane %v4186_v35, %v4079_v30 }
 0x218   :  { %3739 = vmatmul.mubr.msk.bf16.vlgmr.msra.gmra.mrb[24].mxu0 %vm2951_vm4, %v3829_v1 }
 0x219   :  { %3743 = vmatpush3.bf16.msra.mxu0 %v3830_v14  ;;  %3758 = vmatprep.mubr.msk.bf16.mxu0 %vm3919_vm3, %v3918_v4 }
 0x21a   :  { %3708 = vmatpush3.bf16.msra.mxu1 %v3818_v20  ;;  %3744 = vmatprep.subr.bf16.mxu0 %v3918_v4  ;;  %v1248_v20 = vrot.slane %v4186_v35, %v4086_v36 }
 0x21b   :  { %3709 = vmatprep.subr.bf16.mxu1 %v3819_v27 }
 0x21d   :  { %3745 = vmatpush3.bf16.msra.mxu0 %v3831_v3  ;;  %v3314_v3 = vld [vmem:[#allocation2] sm:$0x1] }
 0x21e   :  { %3710 = vmatpush3.bf16.msra.mxu1 %v3820_v22  ;;  %3746 = vmatprep.subr.bf16.mxu0 %v3918_v4 }
 0x21f   :  { %3711 = vmatprep.subr.bf16.mxu1 %v3821_v34  ;;  %3317 = vperm.xlu0 %3811, %v3314_v3  }
 0x221   :  { %3747 = vmatpush3.bf16.msra.mxu0 %v3832_v19  ;;  %v3691_v19 = vld [vmem:[%s4317_s10] ss:$0 sm:$0xff]  ;;  %s3920_s10 = smov [#allocation8]  }
 0x222   :  { %3712 = vmatpush3.bf16.msra.mxu1 %v3822_v41  ;;  %3748 = vmatprep.subr.bf16.mxu0 %v3918_v4  ;;  %s3333_s14 = sshll.u32 %s3920_s10, 4  ;;  %s3334_s14 = int_to_ptr.vmem [resolvable:$true] %s3333_s14 }
 0x223   :  { %3713 = vmatprep.subr.bf16.mxu1 %v3823_v46  ;;  %s3882_s15 = scalar_lea.vmem %s3334_s14, 16  ;;  %s3886_s16 = scalar_lea.vmem %s3334_s14, 32 }
 0x224   :  { %p3883_p2 = scmp.ne.s32.totalorder %s3334_s14, %s3882_s15  ;;  %p3887_p3 = scmp.lt.s32.totalorder %s3334_s14, %s3334_s14 }
 0x225   :  { %3749 = vmatpush3.bf16.msra.mxu0 %v3833_v15  ;;  %p3888_p4 = scmp.lt.s32.totalorder %s3886_s16, %s3882_s15 }
 0x226   :  { %3714 = vmatpush3.bf16.msra.mxu1 %v3824_v52  ;;  %3750 = vmatprep.subr.bf16.mxu0 %v3918_v4 }
 0x227   :  { %3715 = vmatprep.subr.bf16.mxu1 %v3825_v58  ;;  %p3889_p5 = por %p3888_p4, %p3887_p3 }
 0x229   :  { %3751 = vmatpush3.bf16.msra.mxu0 %v3834_v16  ;;  %p3890_p6 = pnand %p3889_p5, %p3883_p2 }
 0x22a   :  { %3716 = vmatpush3.bf16.msra.mxu1 %v3826_v60  ;;  %3752 = vmatprep.subr.bf16.mxu0 %v3918_v4 }
 0x22b   :  { %3717 = vmatprep.subr.bf16.mxu1 %v3827_v12 }
 0x22e   :  { %3718 = vmatpush3.bf16.msra.mxu1 %v3828_v5 }
 0x22f   :  { %3762 = vmatprep.subr.bf16.mxu1 %v3918_v4 }
 0x263   :  { %v2614_v38 = vpop.f32.mrb[16].mxu0  ;;  %v2700_v39 = vpop.f32.mrb[16].mxu1 }
 0x264   :  { %v3768_v31 = vadd.f32 %v2614_v38, %v1220_v13  ;;  %v3772_v6 = vadd.f32 %v2700_v39, %v1228_v23  ;;  %v2616_v7 = vpop.f32.mrb[17].mxu0  ;;  %v2702_v8 = vpop.f32.mrb[17].mxu1 }
 0x265   :  { %v3769_v9 = vadd.f32 %v2616_v7, %v1224_v29  ;;  %v3773_v10 = vadd.f32 %v2702_v8, %v1232_v32  ;;  %v2618_v11 = vpop.f32.mrb[18].mxu0  ;;  %v2704_v26 = vpop.f32.mrb[18].mxu1 }
 0x266   :  { %v2881_v42 = vmax.f32 %v3768_v31, 0.0  ;;  %v2883_v24 = vmax.f32 %v3772_v6, 0.0  ;;  %v3770_v43 = vadd.f32 %v2618_v11, %v1220_v13  ;;  %v3774_v44 = vadd.f32 %v2704_v26, %v1228_v23  ;;  %v2620_v40 = vpop.f32.mrb[19].mxu0  ;;  %v2706_v37 = vpop.f32.mrb[19].mxu1 }
 0x267   :  { %v2882_v47 = vmax.f32 %v3769_v9, 0.0  ;;  %v2884_v49 = vmax.f32 %v3773_v10, 0.0  ;;  %v3771_v50 = vadd.f32 %v2620_v40, %v1224_v29  ;;  %v3775_v51 = vadd.f32 %v2706_v37, %v1232_v32 }
 0x268   :  { %v4205_v53 = vmax.f32 %v2881_v42, %v2883_v24  ;;  %v2889_v45 = vmax.f32 %v3770_v43, 0.0  ;;  %v2891_v54 = vmax.f32 %v3774_v44, 0.0 }
 0x269   :  { %v4207_v55 = vmax.f32 %v2882_v47, %v2884_v49  ;;  %v2890_v56 = vmax.f32 %v3771_v50, 0.0  ;;  %v2892_v48 = vmax.f32 %v3775_v51, 0.0 }
 0x26a   :  { %v4209_v57 = vmax.f32 %v2889_v45, %v2891_v54 }
 0x26b   :  { %v4214_v59 = vmax.f32 %v2890_v56, %v2892_v48  ;;  %v3836_v56 = vld [vmem:[%s4316_s9 + $0x30] sm:$0xff]   ;;  %v3837_v48 = vld [vmem:[%s4316_s9 + $0x38] sm:$0xff]  }
 0x2e3   :  { %v2786_v27 = vpop.f32.mrb[20].mxu0 }
 0x2e4   :  { %v3776_v22 = vadd.f32 %v2786_v27, %v1236_v17  ;;  %v2872_v34 = vpop.f32.mrb[20].mxu1  ;;  %v2788_v13 = vpop.f32.mrb[21].mxu0 }
 0x2e5   :  { %v3780_v23 = vadd.f32 %v2872_v34, %v1244_v25  ;;  %v3777_v29 = vadd.f32 %v2788_v13, %v1240_v18  ;;  %v2874_v32 = vpop.f32.mrb[21].mxu1  ;;  %v2790_v38 = vpop.f32.mrb[22].mxu0 }
 0x2e6   :  { %v2885_v39 = vmax.f32 %v3776_v22, 0.0  ;;  %v3781_v41 = vadd.f32 %v2874_v32, %v1248_v20  ;;  %v3778_v28 = vadd.f32 %v2790_v38, %v1236_v17  ;;  %v2876_v31 = vpop.f32.mrb[22].mxu1  ;;  %v2792_v6 = vpop.f32.mrb[23].mxu0 }
 0x2e7   :  { %v2887_v33 = vmax.f32 %v3780_v23, 0.0  ;;  %v2886_v7 = vmax.f32 %v3777_v29, 0.0  ;;  %v3782_v8 = vadd.f32 %v2876_v31, %v1244_v25  ;;  %v3779_v30 = vadd.f32 %v2792_v6, %v1240_v18  ;;  %v2878_v9 = vpop.f32.mrb[23].mxu1  ;;  %v3266_v23 = vld [vmem:[%s4318_s11] sm:$0xf]  ;;  %v3318_v29 = vpop.permute.xlu0 %3317 }
 0x2e8   :  { %v2888_v10 = vmax.f32 %v3781_v41, 0.0  ;;  %v2893_v36 = vmax.f32 %v3778_v28, 0.0  ;;  %v3783_v35 = vadd.f32 %v2878_v9, %v1248_v20  ;;  %v3323_v32 = vrot.slane %v3318_v29, %v4064_v21 }
 0x2e9   :  { %v2901_v11 = vmax.f32 %v2885_v39, %v2887_v33  ;;  %v2895_v26 = vmax.f32 %v3782_v8, 0.0  ;;  %v2894_v42 = vmax.f32 %v3779_v30, 0.0 }
 0x2ea   :  { %v2902_v24 = vmax.f32 %v2886_v7, %v2888_v10  ;;  %v2896_v43 = vmax.f32 %v3783_v35, 0.0 }
 0x2eb   :  { %v2905_v44 = vmax.f32 %v4205_v53, %v2901_v11  ;;  %v2903_v40 = vmax.f32 %v2893_v36, %v2895_v26  ;;  %v2996_v52 = vpop.f32.mrb[24].mxu0  ;;  %v3835_v53 = vld [vmem:[%s4316_s9 + $0x28] sm:$0xff]  }
 0x2ec   :  { %v2906_v37 = vmax.f32 %v4207_v55, %v2902_v24  ;;  %v2904_v46 = vmax.f32 %v2894_v42, %v2896_v43  ;;  %v3740_v45 = vpop.f32.mrb[25].mxu0  ;;  %3753 = vmatpush3.bf16.msra.mxu0 %v3835_v53 }
 0x2ed   :  { %v2907_v47 = vmax.f32 %v4209_v57, %v2903_v40  ;;  %v2999_v54 = vpop.f32.mrb[26].mxu0  ;;  %3754 = vmatprep.subr.bf16.mxu0 %v3918_v4 }
 0x2ee   :  { %v2908_v49 = vmax.f32 %v4214_v59, %v2904_v46  ;;  %v3741_v55 = vpop.f32.mrb[27].mxu0 }
 0x2ef   :  { %v2909_v50 = vpack.c.bf16 %v2907_v47, %v2905_v44 }
 0x2f0   :  { %v2910_v51 = vpack.c.bf16 %v2908_v49, %v2906_v37  ;;  %3755 = vmatpush3.bf16.msra.mxu0 %v3836_v56 }
 0x2f1   :  { %3756 = vmatprep.subr.bf16.mxu0 %v3918_v4 }
 0x2f2   :  { %3131 = vmatprep.mubr.bf16.mxu1 %v2910_v51 }
 0x2f3   :  { %3132 = vmatmul.mubr.bf16.vlgmr.msra.gmra.mrb[24].mxu1 %v2909_v50 }
 0x2f4   :  { %3764 = vmatprep.mubr.msk.bf16.mxu1 %vm3919_vm3, %v3918_v4  ;;  %3757 = vmatpush3.bf16.msra.mxu0 %v3837_v48 }
 0x3c6   :  { %v3719_v57 = vpop.f32.mrb[24].mxu1 }
 0x3c7   :  { %v3720_v58 = vpop.f32.mrb[25].mxu1 }
 0x3c8   :  { %v3721_v59 = vadd.f32 %v3720_v58, %v3719_v57  ;;  %v3722_v60 = vpop.f32.mrb[26].mxu1 }
 0x3c9   :  { %v3723_v63 = vpop.f32.mrb[27].mxu1 }
 0x3ca   :  { %v3134_v0 = vadd.f32 %v3721_v59, %v2996_v52  ;;  %v3724_v61 = vadd.f32 %v3723_v63, %v3722_v60 }
 0x3cc   :  { %v3147_v12 = vadd.f32 %v3690_v62, %v3134_v0  ;;  %v3137_v2 = vadd.f32 %v3724_v61, %v2999_v54 }
 0x3ce   :  { %v3148_v5 = vadd.f32 %v3690_v62, %v3137_v2  ;;  %v3149_v4 = vmax.f32 %v3147_v12, 0.0 }
 0x3d0   :  { %v3150_v1 = vmax.f32 %v3148_v5, 0.0 }
 0x3d2   :  { %v3151_v14 = vpack.c.bf16 %v3150_v1, %v3149_v4 }
 0x3d4   :  { %3759 = vmatmul.mubr.bf16.vlgmr.msra.gmra.mrb[28].mxu0 %v3151_v14 }
 0x4a7   :  { %v3257_v15 = vpop.f32.mrb[28].mxu0 }
 0x4a8   :  { %v3258_v16 = vadd.f32 %v3691_v19, %v3257_v15  ;;  %v3760_v17 = vpop.f32.mrb[29].mxu0 }
 0x4a9   :  { %v3260_v25 = vpop.f32.mrb[30].mxu0 }
 0x4aa   :  { %v3261_v18 = vadd.f32 %v3691_v19, %v3260_v25  ;;  %v3761_v20 = vpop.f32.mrb[31].mxu0  ;;  %v3264_v27 = vmax.f32 %v3258_v16, 0.0 }
 0x4ac   :  { %v3265_v22 = vmax.f32 %v3261_v18, 0.0 }
 0x4ae   :  { %v3267_v34 = vpack.c.bf16 %v3265_v22, %v3264_v27 }
 0x4b0   :  { %v3272_v13 = vsel %vm551_vm0, %v3267_v34, 0 }
 0x4b1   :  { %3763 = vmatpush3.bf16.xpose.msra.mxu1 %v3272_v13 }
 0x4b8   :  { %3765 = vmatmul.mubr.msk.bf16.vlgmr.msra.gmra.mrb[28].mxu1 %vm551_vm0, %v3266_v23 }
 0x58b   :  { %v3308_v38 = vpop.f32.mrb[28].mxu1 }
 0x58c   :  { %v3324_v39 = vadd.f32 %v3323_v32, %v3308_v38  ;;  %v3766_v41 = vpop.f32.mrb[29].mxu1 }
 0x58d   :  { %v3311_v28 = vpop.f32.mrb[30].mxu1 }
 0x58e   :  { %v3767_v31 = vpop.f32.mrb[31].mxu1  ;;  %3326 = vst.msk [vmem:[#allocation8] sm:$0x1] %vm3325_vm5, %v3324_v39 }
 0x58f   :  { %3893 = shalt.err (!%p3890_p6)
}
 0x590   :  { %s3894_s7 = scalar_lea.hbm %s4320_s13, 16 }
 0x591   :  { %p3895_p7 = scmp.ne.s32.totalorder %s4320_s13, %s3894_s7  ;;  %p3898_p8 = scmp.lt.u32.totalorder %s3894_s7, %s4320_s13 }
 0x593   :  { %p3900_p9 = pnand %p3898_p8, %p3895_p7 }
 0x595   :  { %3903 = shalt.err (!%p3900_p9)
}
 0x596   :  { %3336 = dma.vmem_to_hbm [thread:$0]  %s3334_s14, 16, %s4320_s13, [#allocation5]  }
 0x597   :  { %3908 = dma.done.wait [#allocation5], 16  }
 0x598   :  { %3909 = vsyncadd [#allocation5], 4294967280 }
 0x599   :  { %3340 = vsyncpa [#allocation4], 1 }
 0x59a   :  { %3341 = vsyncpa [#allocation7], 1 }
 0x59b   :  { %3342 = vsyncpa [#allocation5], 1 }

</bundles_post_ra>
